<compile_context>
chip_gen: v7x
topology: tpu7x:2x2x1
jax: 0.10.0
libtpu: 0.0.40
codegen_flags: <defaults>
</compile_context>

<pallas_src>
import math

import jax
import jax.numpy as jnp
from jax.experimental import pallas as pl
from jax.experimental.pallas import tpu as pltpu

LANE = 128


# ----------------------------- kernel helpers ------------------------------

def _layer_norm(x, gamma, beta, eps=1e-7):
    # x: (M, H) f32, gamma/beta: (1, H) f32
    mean = jnp.mean(x, axis=-1, keepdims=True)
    xc = x - mean
    var = jnp.mean(xc * xc, axis=-1, keepdims=True)
    return xc * jax.lax.rsqrt(var + eps) * gamma + beta


def _gelu_tanh(x):
    c = math.sqrt(2.0 / math.pi)
    return 0.5 * x * (1.0 + jnp.tanh(c * (x + 0.044715 * x * x * x)))


# ------------------------------ Pallas kernel ------------------------------

def _f25_kernel(x_ref, mb_ref,
                wqkv_ref, bqkv_ref, wo_ref, bo_ref,
                g1_ref, be1_ref,
                w1_ref, b1_ref, w2_ref, b2_ref,
                g2_ref, be2_ref,
                wh_ref, bh_ref,
                hid_out_ref, logit_out_ref):
    f32 = jnp.float32
    bf16 = jnp.bfloat16

    S = x_ref.shape[1]
    H = x_ref.shape[2]
    TQ = hid_out_ref.shape[1]

    qi = pl.program_id(1)
    row0 = pl.multiple_of(qi * TQ, TQ)

    # Whole-sequence activations (bf16) + this step's query-row tile.
    x_full = x_ref[0]                                   # (S, H)  bf16
    x_tile = x_ref[0, pl.ds(row0, TQ), :]               # (TQ, H) bf16
    mask_bias = mb_ref[0]                               # (1, S)  f32, additive

    # --- fused QKV projection (bf16 MXU, f32 accumulate) ---
    # K/V over the whole sequence (needed by every query tile), Q only for
    # this tile's rows.  Weight is stored fused as [H, 3H].
    kv = jnp.dot(x_full, wqkv_ref[:, H:],
                 preferred_element_type=f32) + bqkv_ref[:, H:].astype(f32)
    k = kv[:, :H]                                        # (S, H) f32
    v = kv[:, H:]                                        # (S, H) f32
    q = jnp.dot(x_tile, wqkv_ref[:, :H],
                preferred_element_type=f32) + bqkv_ref[:, :H].astype(f32)

    # --- attention scores for this query tile: (TQ, S) ---
    scale = 1.0 / math.sqrt(H)
    scores = jax.lax.dot_general(
        q.astype(bf16), k.astype(bf16),
        dimension_numbers=(((1,), (1,)), ((), ())),
        preferred_element_type=f32) * scale
    scores = scores + mask_bias                          # broadcast over rows

    # --- softmax (f32, EUP reciprocal) ---
    scores = scores - jnp.max(scores, axis=-1, keepdims=True)
    p = jnp.exp(scores)
    p = p * pl.reciprocal(jnp.sum(p, axis=-1, keepdims=True), approx=True)

    ctx = jnp.dot(p.astype(bf16), v.astype(bf16),
                  preferred_element_type=f32)            # (TQ, H)
    attn = jnp.dot(ctx.astype(bf16), wo_ref[...],
                   preferred_element_type=f32) + bo_ref[...].astype(f32)

    h1 = _layer_norm(x_tile.astype(f32) + attn,
                     g1_ref[...].astype(f32), be1_ref[...].astype(f32))

    # --- feed forward (bf16 MXU operands, f32 elementwise) ---
    ff = jnp.dot(h1.astype(bf16), w1_ref[...],
                 preferred_element_type=f32) + b1_ref[...].astype(f32)
    ff = _gelu_tanh(ff)
    ff = jnp.dot(ff.astype(bf16), w2_ref[...],
                 preferred_element_type=f32) + b2_ref[...].astype(f32)

    h2 = _layer_norm(h1 + ff,
                     g2_ref[...].astype(f32), be2_ref[...].astype(f32))

    # --- classification head into a lane-dense (TQ, LP) padded slab ---
    logits = jnp.dot(h2.astype(bf16), wh_ref[...],
                     preferred_element_type=f32) + bh_ref[...].astype(f32)

    hid_out_ref[0] = h2.astype(hid_out_ref.dtype)
    logit_out_ref[0] = logits.astype(logit_out_ref.dtype)


# ------------------------------ host wrapper -------------------------------

def f25_forward(input_ids, attention_mask, params):
    """Returns (logits [B,S,L], last_hidden_state [B,S,H])."""
    B, S = input_ids.shape
    H = params["emb"].shape[1]
    L = params["wh"].shape[1]
    F = params["w1"].shape[1]

    TQ = min(S, 128)
    assert S % TQ == 0, "sequence length must be a multiple of the query tile"
    QT = S // TQ
    LP = pl.cdiv(L, LANE) * LANE          # lane-dense padded logits width

    # Glue: embedding lookup (gather) stays in plain JAX, but in bf16.
    x = params["emb"][input_ids]                                      # (B, S, H) bf16
    # Additive mask bias, lane-dense along S.
    mask_bias = ((1.0 - attention_mask.astype(jnp.float32)) * -1e9)   # (B, S)
    mask_bias = mask_bias.reshape(B, 1, S)

    # Fused QKV weight/bias; zero-padded classification head (lane multiple).
    w_qkv = jnp.concatenate([params["wq"], params["wk"], params["wv"]], axis=1)
    b_qkv = jnp.concatenate([params["bq"], params["bk"], params["bv"]], axis=1)
    wh_p = jnp.zeros((H, LP), params["wh"].dtype).at[:, :L].set(params["wh"])
    bh_p = jnp.zeros((1, LP), params["bh"].dtype).at[:, :L].set(params["bh"])

    full = lambda shape: pl.BlockSpec(shape, lambda b, qi: (0,) * len(shape))

    in_specs = [
        pl.BlockSpec((1, S, H), lambda b, qi: (b, 0, 0)),   # x (full sequence)
        pl.BlockSpec((1, 1, S), lambda b, qi: (b, 0, 0)),   # mask bias row
        full((H, 3 * H)), full((1, 3 * H)),                 # fused qkv w, b
        full((H, H)), full((1, H)),                         # wo, bo
        full((1, H)), full((1, H)),                         # ln1 gamma, beta
        full((H, F)), full((1, F)),                         # w1, b1
        full((F, H)), full((1, H)),                         # w2, b2
        full((1, H)), full((1, H)),                         # ln2 gamma, beta
        full((H, LP)), full((1, LP)),                       # padded head w, b
    ]

    out_specs = (
        pl.BlockSpec((1, TQ, H), lambda b, qi: (b, qi, 0)),
        pl.BlockSpec((1, TQ, LP), lambda b, qi: (b, qi, 0)),
    )

    out_shape = (
        jax.ShapeDtypeStruct((B, S, H), jnp.float32),   # last_hidden_state
        jax.ShapeDtypeStruct((B, S, LP), jnp.float32),  # padded logits
    )

    hidden, logits_p = pl.pallas_call(
        _f25_kernel,
        grid_spec=pltpu.PrefetchScalarGridSpec(
            num_scalar_prefetch=0,
            grid=(B, QT),
            in_specs=in_specs,
            out_specs=out_specs,
        ),
        out_shape=out_shape,
        compiler_params=pltpu.CompilerParams(
            dimension_semantics=("parallel", "parallel"),
            vmem_limit_bytes=64 * 1024 * 1024),
    )(x, mask_bias,
      w_qkv, b_qkv, params["wo"], params["bo"],
      params["g1"], params["be1"],
      params["w1"], params["b1"], params["w2"], params["b2"],
      params["g2"], params["be2"],
      wh_p, bh_p)

    return logits_p[:, :, :L], hidden


# --------------------------- deterministic params --------------------------

def make_params(key, vocab, H, F, L):
    """All parameters stored in bf16 (matmul-operand dtype)."""
    ks = jax.random.split(key, 12)
    s = 0.02
    bf = jnp.bfloat16
    p = {
        "emb": (jax.random.normal(ks[0], (vocab, H), jnp.float32) * s).astype(bf),
        "wq": (jax.random.normal(ks[1], (H, H), jnp.float32) * s).astype(bf),
        "wk": (jax.random.normal(ks[2], (H, H), jnp.float32) * s).astype(bf),
        "wv": (jax.random.normal(ks[3], (H, H), jnp.float32) * s).astype(bf),
        "wo": (jax.random.normal(ks[4], (H, H), jnp.float32) * s).astype(bf),
        "w1": (jax.random.normal(ks[5], (H, F), jnp.float32) * s).astype(bf),
        "w2": (jax.random.normal(ks[6], (F, H), jnp.float32) * s).astype(bf),
        "wh": (jax.random.normal(ks[7], (H, L), jnp.float32) * s).astype(bf),
        "bq": jnp.zeros((1, H), bf),
        "bk": jnp.zeros((1, H), bf),
        "bv": jnp.zeros((1, H), bf),
        "bo": jnp.zeros((1, H), bf),
        "b1": jnp.zeros((1, F), bf),
        "b2": jnp.zeros((1, H), bf),
        "bh": (jax.random.normal(ks[8], (1, L), jnp.float32) * s).astype(bf),
        "g1": jnp.ones((1, H), bf),
        "be1": jnp.zeros((1, H), bf),
        "g2": jnp.ones((1, H), bf),
        "be2": jnp.zeros((1, H), bf),
    }
    return p


# -------------------------------- reference --------------------------------

def _ref_forward(input_ids, attention_mask, params):
    # Pure-f32 math on the same bf16-stored parameters.
    p = {k: v.astype(jnp.float32) for k, v in params.items()}
    x = p["emb"][input_ids]
    B, S, H = x.shape
    mb = ((1.0 - attention_mask.astype(jnp.float32)) * -1e9)[:, None, :]
    q = x @ p["wq"] + p["bq"]
    k = x @ p["wk"] + p["bk"]
    v = x @ p["wv"] + p["bv"]
    sc = jnp.einsum("bqd,bkd->bqk", q, k) / math.sqrt(H) + mb
    pr = jax.nn.softmax(sc, axis=-1)
    attn = jnp.einsum("bqk,bkd->bqd", pr, v) @ p["wo"] + p["bo"]

    def ln(t, g, b, eps=1e-7):
        m = t.mean(-1, keepdims=True)
        var = ((t - m) ** 2).mean(-1, keepdims=True)
        return (t - m) * jax.lax.rsqrt(var + eps) * g + b

    h1 = ln(x + attn, p["g1"], p["be1"])
    c = math.sqrt(2.0 / math.pi)
    ff = h1 @ p["w1"] + p["b1"]
    ff = 0.5 * ff * (1.0 + jnp.tanh(c * (ff + 0.044715 * ff ** 3)))
    ff = ff @ p["w2"] + p["b2"]
    h2 = ln(h1 + ff, p["g2"], p["be2"])
    return h2 @ p["wh"] + p["bh"], h2


# ----------------------------------- main -----------------------------------

if __name__ == "__main__":
    B, S, H, F, L, VOCAB = 2, 8, 32, 64, 8, 64

    key = jax.random.PRNGKey(0)
    k_ids, k_par = jax.random.split(key)
    params = make_params(k_par, VOCAB, H, F, L)

    input_ids = jax.random.randint(k_ids, (B, S), 0, VOCAB, dtype=jnp.int32)
    attention_mask = jnp.ones((B, S), dtype=jnp.int32).at[1, 6:].set(0)

    logits, hidden = f25_forward(input_ids, attention_mask, params)
    jax.block_until_ready((logits, hidden))

    ref_logits, ref_hidden = _ref_forward(input_ids, attention_mask, params)
    assert logits.shape == (B, S, L) and hidden.shape == (B, S, H)
    # Tolerances loosened for bf16 matmul operands (math kept in f32).
    assert jnp.allclose(logits, ref_logits, atol=2e-2, rtol=2e-2)
    assert jnp.allclose(hidden, ref_hidden, atol=2e-2, rtol=2e-2)

    print("KERNEL_OK")
</pallas_src>

<mosaic_0001>
module attributes {stable_mosaic.version = 11 : i64} {
  func.func @_f25_kernel(%arg0: i32, %arg1: i32, %arg2: memref<1x8x32xbf16, #tpu.memory_space<vmem>>, %arg3: memref<1x1x8xf32, #tpu.memory_space<vmem>>, %arg4: memref<32x96xbf16, #tpu.memory_space<vmem>>, %arg5: memref<1x96xbf16, #tpu.memory_space<vmem>>, %arg6: memref<32x32xbf16, #tpu.memory_space<vmem>>, %arg7: memref<1x32xbf16, #tpu.memory_space<vmem>>, %arg8: memref<1x32xbf16, #tpu.memory_space<vmem>>, %arg9: memref<1x32xbf16, #tpu.memory_space<vmem>>, %arg10: memref<32x64xbf16, #tpu.memory_space<vmem>>, %arg11: memref<1x64xbf16, #tpu.memory_space<vmem>>, %arg12: memref<64x32xbf16, #tpu.memory_space<vmem>>, %arg13: memref<1x32xbf16, #tpu.memory_space<vmem>>, %arg14: memref<1x32xbf16, #tpu.memory_space<vmem>>, %arg15: memref<1x32xbf16, #tpu.memory_space<vmem>>, %arg16: memref<32x128xbf16, #tpu.memory_space<vmem>>, %arg17: memref<1x128xbf16, #tpu.memory_space<vmem>>, %arg18: memref<1x8x32xf32, #tpu.memory_space<vmem>>, %arg19: memref<1x8x128xf32, #tpu.memory_space<vmem>>) attributes {dimension_semantics = [#tpu.dimension_semantics<parallel>, #tpu.dimension_semantics<parallel>], iteration_bounds = array<i64: 2, 1>, scalar_prefetch = 0 : i64, scratch_operands = 0 : i64, tpu.core_type = #tpu.core_type<tc>, window_params = [{transform_indices = @transform_0, window_bounds = array<i64: 1, 8, 32>}, {transform_indices = @transform_1, window_bounds = array<i64: 1, 1, 8>}, {pipeline_mode = #tpu.pipeline_mode<synchronous>, transform_indices = @transform_2, window_bounds = array<i64: 32, 96>}, {pipeline_mode = #tpu.pipeline_mode<synchronous>, transform_indices = @transform_3, window_bounds = array<i64: 1, 96>}, {pipeline_mode = #tpu.pipeline_mode<synchronous>, transform_indices = @transform_4, window_bounds = array<i64: 32, 32>}, {pipeline_mode = #tpu.pipeline_mode<synchronous>, transform_indices = @transform_5, window_bounds = array<i64: 1, 32>}, {pipeline_mode = #tpu.pipeline_mode<synchronous>, transform_indices = @transform_6, window_bounds = array<i64: 1, 32>}, {pipeline_mode = #tpu.pipeline_mode<synchronous>, transform_indices = @transform_7, window_bounds = array<i64: 1, 32>}, {pipeline_mode = #tpu.pipeline_mode<synchronous>, transform_indices = @transform_8, window_bounds = array<i64: 32, 64>}, {pipeline_mode = #tpu.pipeline_mode<synchronous>, transform_indices = @transform_9, window_bounds = array<i64: 1, 64>}, {pipeline_mode = #tpu.pipeline_mode<synchronous>, transform_indices = @transform_10, window_bounds = array<i64: 64, 32>}, {pipeline_mode = #tpu.pipeline_mode<synchronous>, transform_indices = @transform_11, window_bounds = array<i64: 1, 32>}, {pipeline_mode = #tpu.pipeline_mode<synchronous>, transform_indices = @transform_12, window_bounds = array<i64: 1, 32>}, {pipeline_mode = #tpu.pipeline_mode<synchronous>, transform_indices = @transform_13, window_bounds = array<i64: 1, 32>}, {pipeline_mode = #tpu.pipeline_mode<synchronous>, transform_indices = @transform_14, window_bounds = array<i64: 32, 128>}, {pipeline_mode = #tpu.pipeline_mode<synchronous>, transform_indices = @transform_15, window_bounds = array<i64: 1, 128>}, {transform_indices = @transform_16, window_bounds = array<i64: 1, 8, 32>}, {transform_indices = @transform_17, window_bounds = array<i64: 1, 8, 128>}]} {
    %c8_i32 = arith.constant 8 : i32
    %0 = arith.muli %arg1, %c8_i32 : i32
    %1 = tpu.assume_multiple %0, 8 : i32
    %c0 = arith.constant 0 : index
    %c0_0 = arith.constant 0 : index
    %c0_1 = arith.constant 0 : index
    %2 = vector.load %arg2[%c0, %c0_0, %c0_1] : memref<1x8x32xbf16, #tpu.memory_space<vmem>>, vector<1x8x32xbf16>
    %3 = vector.shape_cast %2 : vector<1x8x32xbf16> to vector<8x32xbf16>
    %c0_2 = arith.constant 0 : index
    %4 = arith.index_cast %1 : i32 to index
    %c0_3 = arith.constant 0 : index
    %5 = vector.load %arg2[%c0_2, %4, %c0_3] : memref<1x8x32xbf16, #tpu.memory_space<vmem>>, vector<1x8x32xbf16>
    %6 = vector.shape_cast %5 : vector<1x8x32xbf16> to vector<8x32xbf16>
    %c0_4 = arith.constant 0 : index
    %c0_5 = arith.constant 0 : index
    %c0_6 = arith.constant 0 : index
    %7 = vector.load %arg3[%c0_4, %c0_5, %c0_6] : memref<1x1x8xf32, #tpu.memory_space<vmem>>, vector<1x1x8xf32>
    %8 = vector.shape_cast %7 : vector<1x1x8xf32> to vector<1x8xf32>
    %c0_7 = arith.constant 0 : index
    %c32 = arith.constant 32 : index
    %9 = vector.load %arg4[%c0_7, %c32] : memref<32x96xbf16, #tpu.memory_space<vmem>>, vector<32x64xbf16>
    %cst = arith.constant dense<0.000000e+00> : vector<8x64xf32>
    %10 = tpu.matmul %3, %9, %cst {dimension_numbers = #tpu.dot_dimension_numbers<[1], [0], [0], [1], [0, 0, 1, 1], [], []>} : vector<8x32xbf16>, vector<32x64xbf16>, vector<8x64xf32> -> vector<8x64xf32>
    %c0_8 = arith.constant 0 : index
    %c32_9 = arith.constant 32 : index
    %11 = vector.load %arg5[%c0_8, %c32_9] : memref<1x96xbf16, #tpu.memory_space<vmem>>, vector<1x64xbf16>
    %12 = arith.extf %11 : vector<1x64xbf16> to vector<1x64xf32>
    %13 = vector.broadcast %12 : vector<1x64xf32> to vector<8x64xf32>
    %14 = arith.addf %10, %13 : vector<8x64xf32>
    %15 = vector.extract_strided_slice %14 {offsets = [0, 0], sizes = [8, 32], strides = [1, 1]} : vector<8x64xf32> to vector<8x32xf32>
    %16 = vector.extract_strided_slice %14 {offsets = [0, 32], sizes = [8, 32], strides = [1, 1]} : vector<8x64xf32> to vector<8x32xf32>
    %c0_10 = arith.constant 0 : index
    %c0_11 = arith.constant 0 : index
    %17 = vector.load %arg4[%c0_10, %c0_11] : memref<32x96xbf16, #tpu.memory_space<vmem>>, vector<32x32xbf16>
    %cst_12 = arith.constant dense<0.000000e+00> : vector<8x32xf32>
    %18 = tpu.matmul %6, %17, %cst_12 {dimension_numbers = #tpu.dot_dimension_numbers<[1], [0], [0], [1], [0, 0, 1, 1], [], []>} : vector<8x32xbf16>, vector<32x32xbf16>, vector<8x32xf32> -> vector<8x32xf32>
    %c0_13 = arith.constant 0 : index
    %c0_14 = arith.constant 0 : index
    %19 = vector.load %arg5[%c0_13, %c0_14] : memref<1x96xbf16, #tpu.memory_space<vmem>>, vector<1x32xbf16>
    %20 = arith.extf %19 : vector<1x32xbf16> to vector<1x32xf32>
    %21 = vector.broadcast %20 : vector<1x32xf32> to vector<8x32xf32>
    %22 = arith.addf %18, %21 : vector<8x32xf32>
    %23 = arith.truncf %22 : vector<8x32xf32> to vector<8x32xbf16>
    %24 = arith.truncf %15 : vector<8x32xf32> to vector<8x32xbf16>
    %cst_15 = arith.constant dense<0.000000e+00> : vector<8x8xf32>
    %25 = tpu.matmul %23, %24, %cst_15 {dimension_numbers = #tpu.dot_dimension_numbers<[1], [1], [0], [0], [0, 0, 1, 0], [], []>} : vector<8x32xbf16>, vector<8x32xbf16>, vector<8x8xf32> -> vector<8x8xf32>
    %cst_16 = arith.constant 0.176776692 : f32
    %26 = vector.broadcast %cst_16 : f32 to vector<8x8xf32>
    %27 = arith.mulf %25, %26 : vector<8x8xf32>
    %28 = vector.broadcast %8 : vector<1x8xf32> to vector<8x8xf32>
    %29 = arith.addf %27, %28 : vector<8x8xf32>
    %cst_17 = arith.constant dense<0xFF800000> : vector<8xf32>
    %30 = vector.multi_reduction <maximumf>, %29, %cst_17 [1] : vector<8x8xf32> to vector<8xf32>
    %31 = vector.shape_cast %30 : vector<8xf32> to vector<8x1xf32>
    %32 = vector.broadcast %31 : vector<8x1xf32> to vector<8x8xf32>
    %33 = arith.subf %29, %32 : vector<8x8xf32>
    %34 = math.exp %33 : vector<8x8xf32>
    %cst_18 = arith.constant dense<0.000000e+00> : vector<8xf32>
    %35 = vector.multi_reduction <add>, %34, %cst_18 [1] : vector<8x8xf32> to vector<8xf32>
    %36 = vector.shape_cast %35 : vector<8xf32> to vector<8x1xf32>
    %37 = tpu.reciprocal %36 {approx = true} : vector<8x1xf32> -> vector<8x1xf32>
    %38 = vector.broadcast %37 : vector<8x1xf32> to vector<8x8xf32>
    %39 = arith.mulf %34, %38 : vector<8x8xf32>
    %40 = arith.truncf %39 : vector<8x8xf32> to vector<8x8xbf16>
    %41 = arith.truncf %16 : vector<8x32xf32> to vector<8x32xbf16>
    %cst_19 = arith.constant dense<0.000000e+00> : vector<8x32xf32>
    %42 = tpu.matmul %40, %41, %cst_19 {dimension_numbers = #tpu.dot_dimension_numbers<[1], [0], [0], [1], [0, 0, 1, 1], [], []>} : vector<8x8xbf16>, vector<8x32xbf16>, vector<8x32xf32> -> vector<8x32xf32>
    %43 = arith.truncf %42 : vector<8x32xf32> to vector<8x32xbf16>
    %c0_20 = arith.constant 0 : index
    %c0_21 = arith.constant 0 : index
    %44 = vector.load %arg6[%c0_20, %c0_21] : memref<32x32xbf16, #tpu.memory_space<vmem>>, vector<32x32xbf16>
    %cst_22 = arith.constant dense<0.000000e+00> : vector<8x32xf32>
    %45 = tpu.matmul %43, %44, %cst_22 {dimension_numbers = #tpu.dot_dimension_numbers<[1], [0], [0], [1], [0, 0, 1, 1], [], []>} : vector<8x32xbf16>, vector<32x32xbf16>, vector<8x32xf32> -> vector<8x32xf32>
    %c0_23 = arith.constant 0 : index
    %c0_24 = arith.constant 0 : index
    %46 = vector.load %arg7[%c0_23, %c0_24] : memref<1x32xbf16, #tpu.memory_space<vmem>>, vector<1x32xbf16>
    %47 = arith.extf %46 : vector<1x32xbf16> to vector<1x32xf32>
    %48 = vector.broadcast %47 : vector<1x32xf32> to vector<8x32xf32>
    %49 = arith.addf %45, %48 : vector<8x32xf32>
    %50 = arith.extf %6 : vector<8x32xbf16> to vector<8x32xf32>
    %51 = arith.addf %50, %49 : vector<8x32xf32>
    %c0_25 = arith.constant 0 : index
    %c0_26 = arith.constant 0 : index
    %52 = vector.load %arg8[%c0_25, %c0_26] : memref<1x32xbf16, #tpu.memory_space<vmem>>, vector<1x32xbf16>
    %53 = arith.extf %52 : vector<1x32xbf16> to vector<1x32xf32>
    %c0_27 = arith.constant 0 : index
    %c0_28 = arith.constant 0 : index
    %54 = vector.load %arg9[%c0_27, %c0_28] : memref<1x32xbf16, #tpu.memory_space<vmem>>, vector<1x32xbf16>
    %55 = arith.extf %54 : vector<1x32xbf16> to vector<1x32xf32>
    %cst_29 = arith.constant dense<0.000000e+00> : vector<8xf32>
    %56 = vector.multi_reduction <add>, %51, %cst_29 [1] : vector<8x32xf32> to vector<8xf32>
    %57 = vector.shape_cast %56 : vector<8xf32> to vector<8x1xf32>
    %cst_30 = arith.constant 3.200000e+01 : f32
    %58 = vector.broadcast %cst_30 : f32 to vector<8x1xf32>
    %59 = arith.divf %57, %58 : vector<8x1xf32>
    %60 = vector.broadcast %59 : vector<8x1xf32> to vector<8x32xf32>
    %61 = arith.subf %51, %60 : vector<8x32xf32>
    %62 = arith.mulf %61, %61 : vector<8x32xf32>
    %cst_31 = arith.constant dense<0.000000e+00> : vector<8xf32>
    %63 = vector.multi_reduction <add>, %62, %cst_31 [1] : vector<8x32xf32> to vector<8xf32>
    %64 = vector.shape_cast %63 : vector<8xf32> to vector<8x1xf32>
    %cst_32 = arith.constant 3.200000e+01 : f32
    %65 = vector.broadcast %cst_32 : f32 to vector<8x1xf32>
    %66 = arith.divf %64, %65 : vector<8x1xf32>
    %cst_33 = arith.constant 1.000000e-07 : f32
    %67 = vector.broadcast %cst_33 : f32 to vector<8x1xf32>
    %68 = arith.addf %66, %67 : vector<8x1xf32>
    %69 = math.rsqrt %68 : vector<8x1xf32>
    %70 = vector.broadcast %69 : vector<8x1xf32> to vector<8x32xf32>
    %71 = arith.mulf %61, %70 : vector<8x32xf32>
    %72 = vector.broadcast %53 : vector<1x32xf32> to vector<8x32xf32>
    %73 = arith.mulf %71, %72 : vector<8x32xf32>
    %74 = vector.broadcast %55 : vector<1x32xf32> to vector<8x32xf32>
    %75 = arith.addf %73, %74 : vector<8x32xf32>
    %76 = arith.truncf %75 : vector<8x32xf32> to vector<8x32xbf16>
    %c0_34 = arith.constant 0 : index
    %c0_35 = arith.constant 0 : index
    %77 = vector.load %arg10[%c0_34, %c0_35] : memref<32x64xbf16, #tpu.memory_space<vmem>>, vector<32x64xbf16>
    %cst_36 = arith.constant dense<0.000000e+00> : vector<8x64xf32>
    %78 = tpu.matmul %76, %77, %cst_36 {dimension_numbers = #tpu.dot_dimension_numbers<[1], [0], [0], [1], [0, 0, 1, 1], [], []>} : vector<8x32xbf16>, vector<32x64xbf16>, vector<8x64xf32> -> vector<8x64xf32>
    %c0_37 = arith.constant 0 : index
    %c0_38 = arith.constant 0 : index
    %79 = vector.load %arg11[%c0_37, %c0_38] : memref<1x64xbf16, #tpu.memory_space<vmem>>, vector<1x64xbf16>
    %80 = arith.extf %79 : vector<1x64xbf16> to vector<1x64xf32>
    %81 = vector.broadcast %80 : vector<1x64xf32> to vector<8x64xf32>
    %82 = arith.addf %78, %81 : vector<8x64xf32>
    %cst_39 = arith.constant 5.000000e-01 : f32
    %83 = vector.broadcast %cst_39 : f32 to vector<8x64xf32>
    %84 = arith.mulf %83, %82 : vector<8x64xf32>
    %cst_40 = arith.constant 4.471500e-02 : f32
    %85 = vector.broadcast %cst_40 : f32 to vector<8x64xf32>
    %86 = arith.mulf %85, %82 : vector<8x64xf32>
    %87 = arith.mulf %86, %82 : vector<8x64xf32>
    %88 = arith.mulf %87, %82 : vector<8x64xf32>
    %89 = arith.addf %82, %88 : vector<8x64xf32>
    %cst_41 = arith.constant 0.797884583 : f32
    %90 = vector.broadcast %cst_41 : f32 to vector<8x64xf32>
    %91 = arith.mulf %90, %89 : vector<8x64xf32>
    %92 = math.tanh %91 : vector<8x64xf32>
    %cst_42 = arith.constant 1.000000e+00 : f32
    %93 = vector.broadcast %cst_42 : f32 to vector<8x64xf32>
    %94 = arith.addf %93, %92 : vector<8x64xf32>
    %95 = arith.mulf %84, %94 : vector<8x64xf32>
    %96 = arith.truncf %95 : vector<8x64xf32> to vector<8x64xbf16>
    %c0_43 = arith.constant 0 : index
    %c0_44 = arith.constant 0 : index
    %97 = vector.load %arg12[%c0_43, %c0_44] : memref<64x32xbf16, #tpu.memory_space<vmem>>, vector<64x32xbf16>
    %cst_45 = arith.constant dense<0.000000e+00> : vector<8x32xf32>
    %98 = tpu.matmul %96, %97, %cst_45 {dimension_numbers = #tpu.dot_dimension_numbers<[1], [0], [0], [1], [0, 0, 1, 1], [], []>} : vector<8x64xbf16>, vector<64x32xbf16>, vector<8x32xf32> -> vector<8x32xf32>
    %c0_46 = arith.constant 0 : index
    %c0_47 = arith.constant 0 : index
    %99 = vector.load %arg13[%c0_46, %c0_47] : memref<1x32xbf16, #tpu.memory_space<vmem>>, vector<1x32xbf16>
    %100 = arith.extf %99 : vector<1x32xbf16> to vector<1x32xf32>
    %101 = vector.broadcast %100 : vector<1x32xf32> to vector<8x32xf32>
    %102 = arith.addf %98, %101 : vector<8x32xf32>
    %103 = arith.addf %75, %102 : vector<8x32xf32>
    %c0_48 = arith.constant 0 : index
    %c0_49 = arith.constant 0 : index
    %104 = vector.load %arg14[%c0_48, %c0_49] : memref<1x32xbf16, #tpu.memory_space<vmem>>, vector<1x32xbf16>
    %105 = arith.extf %104 : vector<1x32xbf16> to vector<1x32xf32>
    %c0_50 = arith.constant 0 : index
    %c0_51 = arith.constant 0 : index
    %106 = vector.load %arg15[%c0_50, %c0_51] : memref<1x32xbf16, #tpu.memory_space<vmem>>, vector<1x32xbf16>
    %107 = arith.extf %106 : vector<1x32xbf16> to vector<1x32xf32>
    %cst_52 = arith.constant dense<0.000000e+00> : vector<8xf32>
    %108 = vector.multi_reduction <add>, %103, %cst_52 [1] : vector<8x32xf32> to vector<8xf32>
    %109 = vector.shape_cast %108 : vector<8xf32> to vector<8x1xf32>
    %cst_53 = arith.constant 3.200000e+01 : f32
    %110 = vector.broadcast %cst_53 : f32 to vector<8x1xf32>
    %111 = arith.divf %109, %110 : vector<8x1xf32>
    %112 = vector.broadcast %111 : vector<8x1xf32> to vector<8x32xf32>
    %113 = arith.subf %103, %112 : vector<8x32xf32>
    %114 = arith.mulf %113, %113 : vector<8x32xf32>
    %cst_54 = arith.constant dense<0.000000e+00> : vector<8xf32>
    %115 = vector.multi_reduction <add>, %114, %cst_54 [1] : vector<8x32xf32> to vector<8xf32>
    %116 = vector.shape_cast %115 : vector<8xf32> to vector<8x1xf32>
    %cst_55 = arith.constant 3.200000e+01 : f32
    %117 = vector.broadcast %cst_55 : f32 to vector<8x1xf32>
    %118 = arith.divf %116, %117 : vector<8x1xf32>
    %cst_56 = arith.constant 1.000000e-07 : f32
    %119 = vector.broadcast %cst_56 : f32 to vector<8x1xf32>
    %120 = arith.addf %118, %119 : vector<8x1xf32>
    %121 = math.rsqrt %120 : vector<8x1xf32>
    %122 = vector.broadcast %121 : vector<8x1xf32> to vector<8x32xf32>
    %123 = arith.mulf %113, %122 : vector<8x32xf32>
    %124 = vector.broadcast %105 : vector<1x32xf32> to vector<8x32xf32>
    %125 = arith.mulf %123, %124 : vector<8x32xf32>
    %126 = vector.broadcast %107 : vector<1x32xf32> to vector<8x32xf32>
    %127 = arith.addf %125, %126 : vector<8x32xf32>
    %128 = arith.truncf %127 : vector<8x32xf32> to vector<8x32xbf16>
    %c0_57 = arith.constant 0 : index
    %c0_58 = arith.constant 0 : index
    %129 = vector.load %arg16[%c0_57, %c0_58] : memref<32x128xbf16, #tpu.memory_space<vmem>>, vector<32x128xbf16>
    %cst_59 = arith.constant dense<0.000000e+00> : vector<8x128xf32>
    %130 = tpu.matmul %128, %129, %cst_59 {dimension_numbers = #tpu.dot_dimension_numbers<[1], [0], [0], [1], [0, 0, 1, 1], [], []>} : vector<8x32xbf16>, vector<32x128xbf16>, vector<8x128xf32> -> vector<8x128xf32>
    %c0_60 = arith.constant 0 : index
    %c0_61 = arith.constant 0 : index
    %131 = vector.load %arg17[%c0_60, %c0_61] : memref<1x128xbf16, #tpu.memory_space<vmem>>, vector<1x128xbf16>
    %132 = arith.extf %131 : vector<1x128xbf16> to vector<1x128xf32>
    %133 = vector.broadcast %132 : vector<1x128xf32> to vector<8x128xf32>
    %134 = arith.addf %130, %133 : vector<8x128xf32>
    %c0_62 = arith.constant 0 : index
    %c0_63 = arith.constant 0 : index
    %c0_64 = arith.constant 0 : index
    %135 = vector.load %arg18[%c0_62, %c0_63, %c0_64] : memref<1x8x32xf32, #tpu.memory_space<vmem>>, vector<1x8x32xf32>
    %136 = vector.shape_cast %135 : vector<1x8x32xf32> to vector<8x32xf32>
    %137 = vector.shape_cast %127 : vector<8x32xf32> to vector<1x8x32xf32>
    tpu.vector_store %arg18[%c0_62, %c0_63, %c0_64], %137 {strides = array<i32>} : memref<1x8x32xf32, #tpu.memory_space<vmem>>, vector<1x8x32xf32>,
    %c0_65 = arith.constant 0 : index
    %c0_66 = arith.constant 0 : index
    %c0_67 = arith.constant 0 : index
    %138 = vector.load %arg19[%c0_65, %c0_66, %c0_67] : memref<1x8x128xf32, #tpu.memory_space<vmem>>, vector<1x8x128xf32>
    %139 = vector.shape_cast %138 : vector<1x8x128xf32> to vector<8x128xf32>
    %140 = vector.shape_cast %134 : vector<8x128xf32> to vector<1x8x128xf32>
    tpu.vector_store %arg19[%c0_65, %c0_66, %c0_67], %140 {strides = array<i32>} : memref<1x8x128xf32, #tpu.memory_space<vmem>>, vector<1x8x128xf32>,
    return
  }
  func.func @transform_0(%arg0: i32, %arg1: i32) -> (i32, i32, i32) {
    %c0_i32 = arith.constant 0 : i32
    %c0_i32_0 = arith.constant 0 : i32
    %c0_i32_1 = arith.constant 0 : i32
    return %arg0, %c0_i32, %c0_i32_0 : i32, i32, i32
  }
  func.func @transform_1(%arg0: i32, %arg1: i32) -> (i32, i32, i32) {
    %c0_i32 = arith.constant 0 : i32
    %c0_i32_0 = arith.constant 0 : i32
    %c0_i32_1 = arith.constant 0 : i32
    return %arg0, %c0_i32, %c0_i32_0 : i32, i32, i32
  }
  func.func @transform_2(%arg0: i32, %arg1: i32) -> (i32, i32) {
    %c0_i32 = arith.constant 0 : i32
    %c0_i32_0 = arith.constant 0 : i32
    %c0_i32_1 = arith.constant 0 : i32
    return %c0_i32, %c0_i32_0 : i32, i32
  }
  func.func @transform_3(%arg0: i32, %arg1: i32) -> (i32, i32) {
    %c0_i32 = arith.constant 0 : i32
    %c0_i32_0 = arith.constant 0 : i32
    %c0_i32_1 = arith.constant 0 : i32
    return %c0_i32, %c0_i32_0 : i32, i32
  }
  func.func @transform_4(%arg0: i32, %arg1: i32) -> (i32, i32) {
    %c0_i32 = arith.constant 0 : i32
    %c0_i32_0 = arith.constant 0 : i32
    %c0_i32_1 = arith.constant 0 : i32
    return %c0_i32, %c0_i32_0 : i32, i32
  }
  func.func @transform_5(%arg0: i32, %arg1: i32) -> (i32, i32) {
    %c0_i32 = arith.constant 0 : i32
    %c0_i32_0 = arith.constant 0 : i32
    %c0_i32_1 = arith.constant 0 : i32
    return %c0_i32, %c0_i32_0 : i32, i32
  }
  func.func @transform_6(%arg0: i32, %arg1: i32) -> (i32, i32) {
    %c0_i32 = arith.constant 0 : i32
    %c0_i32_0 = arith.constant 0 : i32
    %c0_i32_1 = arith.constant 0 : i32
    return %c0_i32, %c0_i32_0 : i32, i32
  }
  func.func @transform_7(%arg0: i32, %arg1: i32) -> (i32, i32) {
    %c0_i32 = arith.constant 0 : i32
    %c0_i32_0 = arith.constant 0 : i32
    %c0_i32_1 = arith.constant 0 : i32
    return %c0_i32, %c0_i32_0 : i32, i32
  }
  func.func @transform_8(%arg0: i32, %arg1: i32) -> (i32, i32) {
    %c0_i32 = arith.constant 0 : i32
    %c0_i32_0 = arith.constant 0 : i32
    %c0_i32_1 = arith.constant 0 : i32
    return %c0_i32, %c0_i32_0 : i32, i32
  }
  func.func @transform_9(%arg0: i32, %arg1: i32) -> (i32, i32) {
    %c0_i32 = arith.constant 0 : i32
    %c0_i32_0 = arith.constant 0 : i32
    %c0_i32_1 = arith.constant 0 : i32
    return %c0_i32, %c0_i32_0 : i32, i32
  }
  func.func @transform_10(%arg0: i32, %arg1: i32) -> (i32, i32) {
    %c0_i32 = arith.constant 0 : i32
    %c0_i32_0 = arith.constant 0 : i32
    %c0_i32_1 = arith.constant 0 : i32
    return %c0_i32, %c0_i32_0 : i32, i32
  }
  func.func @transform_11(%arg0: i32, %arg1: i32) -> (i32, i32) {
    %c0_i32 = arith.constant 0 : i32
    %c0_i32_0 = arith.constant 0 : i32
    %c0_i32_1 = arith.constant 0 : i32
    return %c0_i32, %c0_i32_0 : i32, i32
  }
  func.func @transform_12(%arg0: i32, %arg1: i32) -> (i32, i32) {
    %c0_i32 = arith.constant 0 : i32
    %c0_i32_0 = arith.constant 0 : i32
    %c0_i32_1 = arith.constant 0 : i32
    return %c0_i32, %c0_i32_0 : i32, i32
  }
  func.func @transform_13(%arg0: i32, %arg1: i32) -> (i32, i32) {
    %c0_i32 = arith.constant 0 : i32
    %c0_i32_0 = arith.constant 0 : i32
    %c0_i32_1 = arith.constant 0 : i32
    return %c0_i32, %c0_i32_0 : i32, i32
  }
  func.func @transform_14(%arg0: i32, %arg1: i32) -> (i32, i32) {
    %c0_i32 = arith.constant 0 : i32
    %c0_i32_0 = arith.constant 0 : i32
    %c0_i32_1 = arith.constant 0 : i32
    return %c0_i32, %c0_i32_0 : i32, i32
  }
  func.func @transform_15(%arg0: i32, %arg1: i32) -> (i32, i32) {
    %c0_i32 = arith.constant 0 : i32
    %c0_i32_0 = arith.constant 0 : i32
    %c0_i32_1 = arith.constant 0 : i32
    return %c0_i32, %c0_i32_0 : i32, i32
  }
  func.func @transform_16(%arg0: i32, %arg1: i32) -> (i32, i32, i32) {
    %c0_i32 = arith.constant 0 : i32
    %c0_i32_0 = arith.constant 0 : i32
    return %arg0, %arg1, %c0_i32 : i32, i32, i32
  }
  func.func @transform_17(%arg0: i32, %arg1: i32) -> (i32, i32, i32) {
    %c0_i32 = arith.constant 0 : i32
    %c0_i32_0 = arith.constant 0 : i32
    return %arg0, %arg1, %c0_i32 : i32, i32, i32
  }
}

</mosaic_0001>

<bundles_post_ra>
// kernel: tpu_custom_call.1
= control target key start
LH: loop header
LB: loop body
LE: loop exit
PB: predicated region body
PF: predicated region fallthrough
CT: control target
= control target key end

     0   :  { %s3473_s0 = inlined_call_operand.hbm [shape: bf16[2,8,32], index: 0, kind: input, shape index: {}]   ;;  %s3474_s1 = inlined_call_operand.hbm [shape: f32[2,1,8], index: 1, kind: input, shape index: {}]   ;;  %s3475_s2 = inlined_call_operand.hbm [shape: bf16[32,96], index: 2, kind: input, shape index: {}]   ;;  %s3476_s3 = inlined_call_operand.hbm [shape: bf16[1,96], index: 3, kind: input, shape index: {}]   ;;  %s3477_s4 = inlined_call_operand.hbm [shape: bf16[32,32], index: 4, kind: input, shape index: {}]   ;;  %s3478_s5 = inlined_call_operand.hbm [shape: bf16[1,32], index: 5, kind: input, shape index: {}]   ;;  %s3479_s6 = inlined_call_operand.hbm [shape: bf16[1,32], index: 6, kind: input, shape index: {}]   ;;  %s3480_s7 = inlined_call_operand.hbm [shape: bf16[1,32], index: 7, kind: input, shape index: {}]   ;;  %s3481_s8 = inlined_call_operand.hbm [shape: bf16[32,64], index: 8, kind: input, shape index: {}]   ;;  %s3482_s9 = inlined_call_operand.hbm [shape: bf16[1,64], index: 9, kind: input, shape index: {}]   ;;  %s3483_s10 = inlined_call_operand.hbm [shape: bf16[64,32], index: 10, kind: input, shape index: {}]   ;;  %s3484_s11 = inlined_call_operand.hbm [shape: bf16[1,32], index: 11, kind: input, shape index: {}]   ;;  %s3485_s12 = inlined_call_operand.hbm [shape: bf16[1,32], index: 12, kind: input, shape index: {}]   ;;  %s3486_s13 = inlined_call_operand.hbm [shape: bf16[1,32], index: 13, kind: input, shape index: {}]   ;;  %s3487_s14 = inlined_call_operand.hbm [shape: bf16[32,128], index: 14, kind: input, shape index: {}]   ;;  %s3488_s15 = inlined_call_operand.hbm [shape: bf16[1,128], index: 15, kind: input, shape index: {}]   ;;  %s3489_s16 = inlined_call_operand.hbm [shape: f32[2,8,32], index: 16, kind: output, shape index: {0}]   ;;  %s3490_s17 = inlined_call_operand.hbm [shape: f32[2,8,128], index: 17, kind: output, shape index: {1}]  }
   0x1   :  { %3512 = sst [smem:[#allocation50_spill]] %s3473_s0 }
   0x2   :  { %3513 = sst [smem:[#allocation51_spill]] %s3474_s1 }
   0x3   :  { %3514 = sst [smem:[#allocation52_spill]] %s3475_s2 }
   0x4   :  { %3515 = sst [smem:[#allocation53_spill]] %s3476_s3 }
   0x5   :  { %3516 = sst [smem:[#allocation54_spill]] %s3477_s4 }
   0x6   :  { %3517 = sst [smem:[#allocation55_spill]] %s3478_s5 }
   0x7   :  { %3518 = sst [smem:[#allocation56_spill]] %s3479_s6 }
   0x8   :  { %3519 = sst [smem:[#allocation57_spill]] %s3480_s7 }
   0x9   :  { %3520 = sst [smem:[#allocation58_spill]] %s3489_s16 }
   0xa   :  { %3521 = sst [smem:[#allocation59_spill]] %s3490_s17 }
   0xb   :  { %23 = vsyncpa [#allocation3], 0 }
   0xc   :  { %25 = vsyncpa [#allocation3 + $0x1], 0 }
   0xd   :  { %26 = vsyncpa [#allocation6], 0 }
   0xe   :  { %28 = vsyncpa [#allocation6 + $0x1], 0 }
   0xf   :  { %29 = vsyncpa [#allocation9], 0 }
  0x10   :  { %30 = vsyncpa [#allocation12], 0 }
  0x11   :  { %31 = vsyncpa [#allocation15], 0 }
  0x12   :  { %32 = vsyncpa [#allocation18], 0 }
  0x13   :  { %33 = vsyncpa [#allocation21], 0 }
  0x14   :  { %34 = vsyncpa [#allocation24], 0 }
  0x15   :  { %35 = vsyncpa [#allocation27], 0 }
  0x16   :  { %36 = vsyncpa [#allocation4], 0 }
  0x17   :  { %38 = vsyncpa [#allocation4 + $0x1], 0 }
  0x18   :  { %39 = vsyncpa [#allocation30], 0 }
  0x19   :  { %41 = vsyncpa [#allocation30 + $0x1], 0  ;;  %s2819_s24 = smov 0   ;;  %s2821_s25 = smov 0  }
  0x1a   :  { %s2823_s26 = smov 0   ;;  %s2825_s27 = smov 0  }
  0x1b   :  { %s2827_s28 = smov 0   ;;  %s2829_s29 = smov 0  }
  0x1c LB: > { %3522 = sst [smem:[#allocation43_spill]] %s2684_s24  ;;  %s2850_s0 = sadd.s32 4294967295, %s2704_s29   ;;  %s2704_s29 = sphi %s2829_s29, %s47_s29   ;;  %s2700_s28 = sphi %s2827_s28, %s3587_s28   ;;  %s2696_s27 = sphi %s2825_s27, %s3585_s27   ;;  %s2692_s26 = sphi %s2823_s26, %s3586_s26   ;;  %s2688_s25 = sphi %s2821_s25, %s3584_s25   ;;  %s2684_s24 = sphi %s2819_s24, %s3583_s24  }
  0x1d   : > { %3523 = sst [smem:[#allocation44_spill]] %s2688_s25  ;;  %p1710_p0 = scmp.ge.s32.totalorder %s2704_s29, 1 }
  0x1e   : > { %3524 = sst [smem:[#allocation45_spill]] %s2692_s26  ;;  %p3503_p1 = scmp.eq.s32.totalorder %s2850_s0, 0 }
  0x1f   : > { %3525 = sst [smem:[#allocation46_spill]] %s2696_s27  ;;  %p466_p2 = scmp.lt.s32.totalorder %s2704_s29, 3 }
  0x20   : > { %3526 = sst [smem:[#allocation47_spill]] %s2700_s28  ;;  %s2706_s18 = smov [#allocation7]  }
  0x21   : > { %3527 = sst [smem:[#allocation48_spill]] %s2850_s0  ;;  %p2855_p3 = pnand %p1710_p0, %p466_p2 }
  0x22   : > { %s478_s19 = sshll.u32 %s2706_s18, 4  ;;  %s2707_s20 = smov [#allocation8]   ;;  %s2859_s19 = int_to_ptr.vmem [resolvable:$true] %s478_s19 }
  0x23   : > { %s3528_s30 = scalar_select %p2855_p3, 1, 0 }
  0x24   : > { %p1926_p4 = pneg %p2855_p3  ;;  %s492_s21 = sshll.u32 %s2707_s20, 4  ;;  %s2870_s21 = int_to_ptr.vmem [resolvable:$true] %s492_s21 }
  0x25   : > { %3529 = sst [smem:[#allocation49_spill]] %s3528_s30  ;;  %s2708_s22 = smov [#allocation11]  }
  0x26   : > { %p2866_p6 = pnand %p1926_p4, %p3503_p1  ;;  %s2872_s23 = sshll.u32 %s2708_s22, 4  ;;  %s517_s23 = int_to_ptr.vmem [resolvable:$true] %s2872_s23 }
  0x27   : > { %s3531_s2 = sld [smem:[#allocation52_spill]] }
  0x28   : > { %p2882_p8 = pneg %p2866_p6 }
  0x2d   : > { %s2102_s16 = scalar_lea.hbm %s3531_s2, 256 }
  0x2e   : > { %p2103_p7 = scmp.ne.s32.totalorder %s3531_s2, %s2102_s16  ;;  %p2109_p11 = scmp.lt.u32.totalorder %s2102_s16, %s3531_s2 }
  0x30   : > { %p2105_p9 = pnand %p2882_p8, %p2103_p7 }
  0x32   : > { %p2106_p10 = pneg %p2105_p9 }
  0x34   : > { %p2111_p12 = pnand %p2109_p11, %p2106_p10 }
  0x36   : > { %2114 = shalt.err (!%p2111_p12)
}
  0x37   : > { %s2115_s17 = scalar_lea.vmem %s2859_s19, 256  ;;  %p2123_p4 = scmp.lt.s32.totalorder %s2859_s19, %s2859_s19 }
  0x38   : > { %p2116_p13 = scmp.ne.s32.totalorder %s2859_s19, %s2115_s17  ;;  %p2124_p5 = scmp.lt.s32.totalorder %s2115_s17, %s2115_s17 }
  0x3a   : > { %p2118_p0 = pnand %p2116_p13, %p2882_p8  ;;  %p2125_p7 = por %p2124_p5, %p2123_p4 }
  0x3c   : > { %p2119_p2 = pneg %p2118_p0 }
  0x3e   : > { %p2126_p9 = pnand %p2125_p7, %p2119_p2 }
  0x40   : > { %2129 = shalt.err (!%p2126_p9)
}
  0x41   : > { %s3505_s27 = smov 64   ;;  %s3507_s16 = smov 4  }
  0x42   : > { %1929 = dma.hbm_to_vmem [thread:$0]  (!%p2866_p6), %s3531_s2, 256, %s2859_s19, [#allocation6], %s3505_s27, %s3505_s27, %s3507_s16  }
  0x43   : > { %s3533_s3 = sld [smem:[#allocation53_spill]] }
  0x49   : > { %s2130_s17 = scalar_lea.hbm %s3533_s3, 16 }
  0x4a   : > { %p2131_p5 = scmp.ne.s32.totalorder %s3533_s3, %s2130_s17  ;;  %p2137_p12 = scmp.lt.u32.totalorder %s2130_s17, %s3533_s3 }
  0x4c   : > { %p2133_p10 = pnand %p2131_p5, %p2882_p8 }
  0x4e   : > { %p2134_p11 = pneg %p2133_p10 }
  0x50   : > { %p2139_p13 = pnand %p2137_p12, %p2134_p11 }
  0x52   : > { %2142 = shalt.err (!%p2139_p13)
}
  0x53   : > { %s2143_s19 = scalar_lea.vmem %s2870_s21, 16  ;;  %s2150_s24 = scalar_lea.vmem %s2870_s21, 32 }
  0x54   : > { %p2144_p0 = scmp.ne.s32.totalorder %s2870_s21, %s2143_s19  ;;  %p2151_p7 = scmp.lt.s32.totalorder %s2870_s21, %s2870_s21 }
  0x55   : > { %p2152_p9 = scmp.lt.s32.totalorder %s2150_s24, %s2143_s19 }
  0x56   : > { %p2146_p2 = pnand %p2144_p0, %p2882_p8 }
  0x57   : > { %p2153_p5 = por %p2152_p9, %p2151_p7 }
  0x58   : > { %p2147_p4 = pneg %p2146_p2 }
  0x5a   : > { %p2154_p10 = pnand %p2153_p5, %p2147_p4 }
  0x5c   : > { %2157 = shalt.err (!%p2154_p10)
}
  0x5d   : > { %1932 = dma.hbm_to_vmem [thread:$0]  (!%p2866_p6), %s3533_s3, 16, %s2870_s21, [#allocation9]  }
  0x5e   : > { %s3534_s5 = sld [smem:[#allocation55_spill]] }
  0x64   : > { %s2158_s18 = scalar_lea.hbm %s3534_s5, 16 }
  0x65   : > { %p2159_p11 = scmp.ne.s32.totalorder %s3534_s5, %s2158_s18  ;;  %p2165_p0 = scmp.lt.u32.totalorder %s2158_s18, %s3534_s5 }
  0x67   : > { %p2161_p12 = pnand %p2159_p11, %p2882_p8 }
  0x69   : > { %p2162_p13 = pneg %p2161_p12 }
  0x6b   : > { %p2167_p2 = pnand %p2165_p0, %p2162_p13 }
  0x6d   : > { %2170 = shalt.err (!%p2167_p2)
}
  0x6e   : > { %s2171_s24 = scalar_lea.vmem %s517_s23, 16  ;;  %s2178_s21 = scalar_lea.vmem %s517_s23, 32 }
  0x6f   : > { %p2172_p4 = scmp.ne.s32.totalorder %s517_s23, %s2171_s24  ;;  %p2179_p5 = scmp.lt.s32.totalorder %s517_s23, %s517_s23 }
  0x70   : > { %p2180_p10 = scmp.lt.s32.totalorder %s2178_s21, %s2171_s24 }
  0x71   : > { %p2174_p7 = pnand %p2172_p4, %p2882_p8 }
  0x72   : > { %p2181_p1 = por %p2180_p10, %p2179_p5 }
  0x73   : > { %p2175_p9 = pneg %p2174_p7 }
  0x75   : > { %p2182_p3 = pnand %p2181_p1, %p2175_p9 }
  0x77   : > { %2185 = shalt.err (!%p2182_p3)
}
  0x78   : > { %1938 = dma.hbm_to_vmem [thread:$0]  (!%p2866_p6), %s3534_s5, 16, %s517_s23, [#allocation12]  }
  0x79   : > { %s2711_s28 = smov [#allocation14]   ;;  %s2712_s18 = smov [#allocation17]  }
  0x7a   : > { %s538_s30 = sshll.u32 %s2711_s28, 4  ;;  %s562_s20 = sshll.u32 %s2712_s18, 4  ;;  %s539_s30 = int_to_ptr.vmem [resolvable:$true] %s538_s30  ;;  %s563_s20 = int_to_ptr.vmem [resolvable:$true] %s562_s20 }
  0x7b   : > { %s3535_s7 = sld [smem:[#allocation57_spill]] }
  0x81   : > { %s2186_s19 = scalar_lea.hbm %s3535_s7, 16 }
  0x82   : > { %p2187_p1 = scmp.ne.s32.totalorder %s3535_s7, %s2186_s19  ;;  %p2193_p12 = scmp.lt.u32.totalorder %s2186_s19, %s3535_s7 }
  0x84   : > { %p2189_p3 = pnand %p2187_p1, %p2882_p8 }
  0x86   : > { %p2190_p11 = pneg %p2189_p3 }
  0x88   : > { %p2195_p13 = pnand %p2193_p12, %p2190_p11 }
  0x8a   : > { %2198 = shalt.err (!%p2195_p13)
}
  0x8b   : > { %s2199_s23 = scalar_lea.vmem %s539_s30, 16  ;;  %s2206_s26 = scalar_lea.vmem %s539_s30, 32 }
  0x8c   : > { %p2200_p0 = scmp.ne.s32.totalorder %s539_s30, %s2199_s23  ;;  %p2207_p7 = scmp.lt.s32.totalorder %s539_s30, %s539_s30 }
  0x8d   : > { %p2208_p9 = scmp.lt.s32.totalorder %s2206_s26, %s2199_s23 }
  0x8e   : > { %p2202_p2 = pnand %p2200_p0, %p2882_p8 }
  0x8f   : > { %p2209_p5 = por %p2208_p9, %p2207_p7 }
  0x90   : > { %p2203_p4 = pneg %p2202_p2 }
  0x92   : > { %p2210_p10 = pnand %p2209_p5, %p2203_p4 }
  0x94   : > { %2213 = shalt.err (!%p2210_p10)
}
  0x95   : > { %1944 = dma.hbm_to_vmem [thread:$0]  (!%p2866_p6), %s3535_s7, 16, %s539_s30, [#allocation15]  }
  0x96   : > { %s2214_s17 = scalar_lea.hbm %s3482_s9, 16 }
  0x97   : > { %p2215_p1 = scmp.ne.s32.totalorder %s3482_s9, %s2214_s17  ;;  %p2221_p12 = scmp.lt.u32.totalorder %s2214_s17, %s3482_s9 }
  0x99   : > { %p2217_p3 = pnand %p2215_p1, %p2882_p8 }
  0x9b   : > { %p2218_p11 = pneg %p2217_p3 }
  0x9d   : > { %p2223_p13 = pnand %p2221_p12, %p2218_p11 }
  0x9f   : > { %2226 = shalt.err (!%p2223_p13)
}
  0xa0   : > { %s2227_s23 = scalar_lea.vmem %s563_s20, 16  ;;  %s2234_s30 = scalar_lea.vmem %s563_s20, 32 }
  0xa1   : > { %p2228_p0 = scmp.ne.s32.totalorder %s563_s20, %s2227_s23  ;;  %p2235_p7 = scmp.lt.s32.totalorder %s563_s20, %s563_s20 }
  0xa2   : > { %p2236_p9 = scmp.lt.s32.totalorder %s2234_s30, %s2227_s23 }
  0xa3   : > { %p2230_p2 = pnand %p2228_p0, %p2882_p8 }
  0xa4   : > { %p2237_p5 = por %p2236_p9, %p2235_p7 }
  0xa5   : > { %p2231_p4 = pneg %p2230_p2 }
  0xa7   : > { %p2238_p10 = pnand %p2237_p5, %p2231_p4 }
  0xa9   : > { %2241 = shalt.err (!%p2238_p10)
}
  0xaa   : > { %1950 = dma.hbm_to_vmem [thread:$0]  (!%p2866_p6), %s3482_s9, 16, %s563_s20, [#allocation18]  }
  0xab   : > { %s2713_s18 = smov [#allocation20]   ;;  %s2714_s22 = smov [#allocation23]  }
  0xac   : > { %s586_s27 = sshll.u32 %s2713_s18, 4  ;;  %s608_s17 = sshll.u32 %s2714_s22, 4  ;;  %s587_s27 = int_to_ptr.vmem [resolvable:$true] %s586_s27  ;;  %s609_s17 = int_to_ptr.vmem [resolvable:$true] %s608_s17 }
  0xad   : > { %s2242_s21 = scalar_lea.hbm %s3484_s11, 16 }
  0xae   : > { %p2243_p1 = scmp.ne.s32.totalorder %s3484_s11, %s2242_s21  ;;  %p2249_p12 = scmp.lt.u32.totalorder %s2242_s21, %s3484_s11 }
  0xb0   : > { %p2245_p3 = pnand %p2243_p1, %p2882_p8 }
  0xb2   : > { %p2246_p11 = pneg %p2245_p3 }
  0xb4   : > { %p2251_p13 = pnand %p2249_p12, %p2246_p11 }
  0xb6   : > { %2254 = shalt.err (!%p2251_p13)
}
  0xb7   : > { %s2255_s20 = scalar_lea.vmem %s587_s27, 16  ;;  %s2262_s28 = scalar_lea.vmem %s587_s27, 32 }
  0xb8   : > { %p2256_p0 = scmp.ne.s32.totalorder %s587_s27, %s2255_s20  ;;  %p2263_p7 = scmp.lt.s32.totalorder %s587_s27, %s587_s27 }
  0xb9   : > { %p2264_p9 = scmp.lt.s32.totalorder %s2262_s28, %s2255_s20 }
  0xba   : > { %p2258_p2 = pnand %p2256_p0, %p2882_p8 }
  0xbb   : > { %p2265_p5 = por %p2264_p9, %p2263_p7 }
  0xbc   : > { %p2259_p4 = pneg %p2258_p2 }
  0xbe   : > { %p2266_p10 = pnand %p2265_p5, %p2259_p4 }
  0xc0   : > { %2269 = shalt.err (!%p2266_p10)
}
  0xc1   : > { %1956 = dma.hbm_to_vmem [thread:$0]  (!%p2866_p6), %s3484_s11, 16, %s587_s27, [#allocation21]  }
  0xc2   : > { %s2270_s21 = scalar_lea.hbm %s3486_s13, 16 }
  0xc3   : > { %p2271_p1 = scmp.ne.s32.totalorder %s3486_s13, %s2270_s21  ;;  %p2277_p12 = scmp.lt.u32.totalorder %s2270_s21, %s3486_s13 }
  0xc5   : > { %p2273_p3 = pnand %p2271_p1, %p2882_p8 }
  0xc7   : > { %p2274_p11 = pneg %p2273_p3 }
  0xc9   : > { %p2279_p13 = pnand %p2277_p12, %p2274_p11 }
  0xcb   : > { %2282 = shalt.err (!%p2279_p13)
}
  0xcc   : > { %s2283_s20 = scalar_lea.vmem %s609_s17, 16  ;;  %s2290_s27 = scalar_lea.vmem %s609_s17, 32 }
  0xcd   : > { %p2284_p0 = scmp.ne.s32.totalorder %s609_s17, %s2283_s20  ;;  %p2291_p7 = scmp.lt.s32.totalorder %s609_s17, %s609_s17 }
  0xce   : > { %p2292_p9 = scmp.lt.s32.totalorder %s2290_s27, %s2283_s20 }
  0xcf   : > { %p2286_p2 = pnand %p2284_p0, %p2882_p8 }
  0xd0   : > { %p2293_p5 = por %p2292_p9, %p2291_p7 }
  0xd1   : > { %p2287_p4 = pneg %p2286_p2 }
  0xd3   : > { %p2294_p10 = pnand %p2293_p5, %p2287_p4 }
  0xd5   : > { %2297 = shalt.err (!%p2294_p10)
}
  0xd6   : > { %1962 = dma.hbm_to_vmem [thread:$0]  (!%p2866_p6), %s3486_s13, 16, %s609_s17, [#allocation24]  }
  0xd7   : > { %s2715_s22 = smov [#allocation10]   ;;  %s2716_s24 = smov [#allocation13]  }
  0xd8   : > { %s502_s19 = sshll.u32 %s2715_s22, 4  ;;  %s527_s21 = sshll.u32 %s2716_s24, 4  ;;  %s503_s19 = int_to_ptr.vmem [resolvable:$true] %s502_s19  ;;  %s528_s21 = int_to_ptr.vmem [resolvable:$true] %s527_s21 }
  0xd9   : > { %s3536_s4 = sld [smem:[#allocation54_spill]] }
  0xdf   : > { %s2298_s30 = scalar_lea.hbm %s3536_s4, 256 }
  0xe0   : > { %p2299_p1 = scmp.ne.s32.totalorder %s3536_s4, %s2298_s30  ;;  %p2305_p12 = scmp.lt.u32.totalorder %s2298_s30, %s3536_s4 }
  0xe2   : > { %p2301_p3 = pnand %p2299_p1, %p2882_p8 }
  0xe4   : > { %p2302_p11 = pneg %p2301_p3 }
  0xe6   : > { %p2307_p13 = pnand %p2305_p12, %p2302_p11 }
  0xe8   : > { %2310 = shalt.err (!%p2307_p13)
}
  0xe9   : > { %s2311_s17 = scalar_lea.vmem %s503_s19, 256  ;;  %p2319_p7 = scmp.lt.s32.totalorder %s503_s19, %s503_s19 }
  0xea   : > { %p2312_p0 = scmp.ne.s32.totalorder %s503_s19, %s2311_s17  ;;  %p2320_p9 = scmp.lt.s32.totalorder %s2311_s17, %s2311_s17 }
  0xec   : > { %p2314_p2 = pnand %p2312_p0, %p2882_p8  ;;  %p2321_p5 = por %p2320_p9, %p2319_p7 }
  0xee   : > { %p2315_p4 = pneg %p2314_p2 }
  0xf0   : > { %p2322_p10 = pnand %p2321_p5, %p2315_p4 }
  0xf2   : > { %2325 = shalt.err (!%p2322_p10)
}
  0xf3   : > { %s3537_s18 = smov 64   ;;  %s3538_s6 = sld [smem:[#allocation56_spill]] }
  0xf4   : > { %1935 = dma.hbm_to_vmem [thread:$0]  (!%p2866_p6), %s3536_s4, 256, %s503_s19, [#allocation9], %s3537_s18, %s3537_s18, %s3507_s16  }
  0xf9   : > { %s2326_s30 = scalar_lea.hbm %s3538_s6, 16 }
  0xfa   : > { %p2327_p1 = scmp.ne.s32.totalorder %s3538_s6, %s2326_s30  ;;  %p2333_p12 = scmp.lt.u32.totalorder %s2326_s30, %s3538_s6 }
  0xfc   : > { %p2329_p3 = pnand %p2327_p1, %p2882_p8 }
  0xfe   : > { %p2330_p11 = pneg %p2329_p3 }
 0x100   : > { %p2335_p13 = pnand %p2333_p12, %p2330_p11 }
 0x102   : > { %2338 = shalt.err (!%p2335_p13)
}
 0x103   : > { %s2339_s17 = scalar_lea.vmem %s528_s21, 16  ;;  %s2346_s19 = scalar_lea.vmem %s528_s21, 32 }
 0x104   : > { %p2340_p0 = scmp.ne.s32.totalorder %s528_s21, %s2339_s17  ;;  %p2347_p7 = scmp.lt.s32.totalorder %s528_s21, %s528_s21 }
 0x105   : > { %p2348_p9 = scmp.lt.s32.totalorder %s2346_s19, %s2339_s17 }
 0x106   : > { %p2342_p2 = pnand %p2340_p0, %p2882_p8 }
 0x107   : > { %p2349_p5 = por %p2348_p9, %p2347_p7 }
 0x108   : > { %p2343_p4 = pneg %p2342_p2 }
 0x10a   : > { %p2350_p10 = pnand %p2349_p5, %p2343_p4 }
 0x10c   : > { %2353 = shalt.err (!%p2350_p10)
}
 0x10d   : > { %1941 = dma.hbm_to_vmem [thread:$0]  (!%p2866_p6), %s3538_s6, 16, %s528_s21, [#allocation12]  }
 0x10e   : > { %s2717_s25 = smov [#allocation16]   ;;  %s2718_s30 = smov [#allocation19]  }
 0x10f   : > { %s548_s23 = sshll.u32 %s2717_s25, 4  ;;  %s572_s26 = sshll.u32 %s2718_s30, 4  ;;  %s549_s23 = int_to_ptr.vmem [resolvable:$true] %s548_s23  ;;  %s573_s26 = int_to_ptr.vmem [resolvable:$true] %s572_s26 }
 0x110   : > { %s2354_s28 = scalar_lea.hbm %s3481_s8, 256 }
 0x111   : > { %p2355_p1 = scmp.ne.s32.totalorder %s3481_s8, %s2354_s28  ;;  %p2361_p12 = scmp.lt.u32.totalorder %s2354_s28, %s3481_s8 }
 0x113   : > { %p2357_p3 = pnand %p2355_p1, %p2882_p8 }
 0x115   : > { %p2358_p11 = pneg %p2357_p3 }
 0x117   : > { %p2363_p13 = pnand %p2361_p12, %p2358_p11 }
 0x119   : > { %2366 = shalt.err (!%p2363_p13)
}
 0x11a   : > { %s2367_s21 = scalar_lea.vmem %s549_s23, 256  ;;  %p2375_p7 = scmp.lt.s32.totalorder %s549_s23, %s549_s23 }
 0x11b   : > { %p2368_p0 = scmp.ne.s32.totalorder %s549_s23, %s2367_s21  ;;  %p2376_p9 = scmp.lt.s32.totalorder %s2367_s21, %s2367_s21 }
 0x11d   : > { %p2370_p2 = pnand %p2368_p0, %p2882_p8  ;;  %p2377_p5 = por %p2376_p9, %p2375_p7 }
 0x11f   : > { %p2371_p4 = pneg %p2370_p2 }
 0x121   : > { %p2378_p10 = pnand %p2377_p5, %p2371_p4 }
 0x123   : > { %2381 = shalt.err (!%p2378_p10)
}
 0x124   : > { %s3539_s24 = smov 4   ;;  %s2382_s27 = scalar_lea.hbm %s3483_s10, 512 }
 0x125   : > { %1947 = dma.hbm_to_vmem [thread:$0]  (!%p2866_p6), %s3481_s8, 256, %s549_s23, [#allocation15], %s3537_s18, %s3537_s18, %s3539_s24  }
 0x126   : > { %p2383_p1 = scmp.ne.s32.totalorder %s3483_s10, %s2382_s27  ;;  %p2389_p12 = scmp.lt.u32.totalorder %s2382_s27, %s3483_s10 }
 0x128   : > { %p2385_p3 = pnand %p2383_p1, %p2882_p8 }
 0x12a   : > { %p2386_p11 = pneg %p2385_p3 }
 0x12c   : > { %p2391_p13 = pnand %p2389_p12, %p2386_p11 }
 0x12e   : > { %2394 = shalt.err (!%p2391_p13)
}
 0x12f   : > { %s2395_s21 = scalar_lea.vmem %s573_s26, 512  ;;  %p2403_p7 = scmp.lt.s32.totalorder %s573_s26, %s573_s26 }
 0x130   : > { %p2396_p0 = scmp.ne.s32.totalorder %s573_s26, %s2395_s21  ;;  %p2404_p9 = scmp.lt.s32.totalorder %s2395_s21, %s2395_s21 }
 0x132   : > { %p2398_p2 = pnand %p2396_p0, %p2882_p8  ;;  %p2405_p5 = por %p2404_p9, %p2403_p7 }
 0x134   : > { %p2399_p4 = pneg %p2398_p2 }
 0x136   : > { %p2406_p10 = pnand %p2405_p5, %p2399_p4 }
 0x138   : > { %2409 = shalt.err (!%p2406_p10)
}
 0x139   : > { %1953 = dma.hbm_to_vmem [thread:$0]  (!%p2866_p6), %s3483_s10, 512, %s573_s26, [#allocation18], %s3537_s18, %s3537_s18, %s3539_s24  }
 0x13a   : > { %s2719_s25 = smov [#allocation22]   ;;  %s2720_s20 = smov [#allocation25]  }
 0x13b   : > { %s597_s30 = sshll.u32 %s2719_s25, 4  ;;  %s618_s27 = sshll.u32 %s2720_s20, 4  ;;  %s598_s30 = int_to_ptr.vmem [resolvable:$true] %s597_s30  ;;  %s619_s27 = int_to_ptr.vmem [resolvable:$true] %s618_s27 }
 0x13c   : > { %s2410_s19 = scalar_lea.hbm %s3485_s12, 16 }
 0x13d   : > { %p2411_p1 = scmp.ne.s32.totalorder %s3485_s12, %s2410_s19  ;;  %p2417_p12 = scmp.lt.u32.totalorder %s2410_s19, %s3485_s12 }
 0x13f   : > { %p2413_p3 = pnand %p2411_p1, %p2882_p8 }
 0x141   : > { %p2414_p11 = pneg %p2413_p3 }
 0x143   : > { %p2419_p13 = pnand %p2417_p12, %p2414_p11 }
 0x145   : > { %2422 = shalt.err (!%p2419_p13)
}
 0x146   : > { %s2423_s26 = scalar_lea.vmem %s598_s30, 16  ;;  %s2430_s16 = scalar_lea.vmem %s598_s30, 32 }
 0x147   : > { %p2424_p0 = scmp.ne.s32.totalorder %s598_s30, %s2423_s26  ;;  %p2431_p7 = scmp.lt.s32.totalorder %s598_s30, %s598_s30 }
 0x148   : > { %p2432_p9 = scmp.lt.s32.totalorder %s2430_s16, %s2423_s26 }
 0x149   : > { %p2426_p2 = pnand %p2424_p0, %p2882_p8 }
 0x14a   : > { %p2433_p5 = por %p2432_p9, %p2431_p7 }
 0x14b   : > { %p2427_p4 = pneg %p2426_p2 }
 0x14d   : > { %p2434_p10 = pnand %p2433_p5, %p2427_p4 }
 0x14f   : > { %2437 = shalt.err (!%p2434_p10)
}
 0x150   : > { %1959 = dma.hbm_to_vmem [thread:$0]  (!%p2866_p6), %s3485_s12, 16, %s598_s30, [#allocation21]  }
 0x151   : > { %s2438_s17 = scalar_lea.hbm %s3487_s14, 256 }
 0x152   : > { %p2439_p1 = scmp.ne.s32.totalorder %s3487_s14, %s2438_s17  ;;  %p2445_p12 = scmp.lt.u32.totalorder %s2438_s17, %s3487_s14 }
 0x154   : > { %p2441_p3 = pnand %p2439_p1, %p2882_p8 }
 0x156   : > { %p2442_p11 = pneg %p2441_p3 }
 0x158   : > { %p2447_p13 = pnand %p2445_p12, %p2442_p11 }
 0x15a   : > { %2450 = shalt.err (!%p2447_p13)
}
 0x15b   : > { %s2451_s26 = scalar_lea.vmem %s619_s27, 256  ;;  %p2459_p7 = scmp.lt.s32.totalorder %s619_s27, %s619_s27 }
 0x15c   : > { %p2452_p0 = scmp.ne.s32.totalorder %s619_s27, %s2451_s26  ;;  %p2460_p9 = scmp.lt.s32.totalorder %s2451_s26, %s2451_s26 }
 0x15e   : > { %p2454_p2 = pnand %p2452_p0, %p2882_p8  ;;  %p2461_p5 = por %p2460_p9, %p2459_p7 }
 0x160   : > { %p2455_p4 = pneg %p2454_p2 }
 0x162   : > { %p2462_p10 = pnand %p2461_p5, %p2455_p4 }
 0x164   : > { %2465 = shalt.err (!%p2462_p10)
}
 0x165   : > { %1965 = dma.hbm_to_vmem [thread:$0]  (!%p2866_p6), %s3487_s14, 256, %s619_s27, [#allocation24], %s3537_s18, %s3537_s18, %s3539_s24  }
 0x166   : > { %s2721_s25 = smov [#allocation26]   ;;  %s2466_s17 = scalar_lea.hbm %s3488_s15, 16 }
 0x167   : > { %s632_s20 = sshll.u32 %s2721_s25, 4  ;;  %p2467_p1 = scmp.ne.s32.totalorder %s3488_s15, %s2466_s17  ;;  %s633_s20 = int_to_ptr.vmem [resolvable:$true] %s632_s20 }
 0x168   : > { %p2473_p12 = scmp.lt.u32.totalorder %s2466_s17, %s3488_s15 }
 0x169   : > { %p2469_p3 = pnand %p2467_p1, %p2882_p8 }
 0x16b   : > { %p2470_p11 = pneg %p2469_p3 }
 0x16d   : > { %p2475_p13 = pnand %p2473_p12, %p2470_p11 }
 0x16f   : > { %2478 = shalt.err (!%p2475_p13)
}
 0x170   : > { %s2479_s18 = scalar_lea.vmem %s633_s20, 16  ;;  %s2486_s24 = scalar_lea.vmem %s633_s20, 32 }
 0x171   : > { %p2480_p0 = scmp.ne.s32.totalorder %s633_s20, %s2479_s18  ;;  %p2487_p7 = scmp.lt.s32.totalorder %s633_s20, %s633_s20 }
 0x172   : > { %p2488_p9 = scmp.lt.s32.totalorder %s2486_s24, %s2479_s18 }
 0x173   : > { %p2482_p2 = pnand %p2480_p0, %p2882_p8 }
 0x174   : > { %p2489_p5 = por %p2488_p9, %p2487_p7 }
 0x175   : > { %p2483_p4 = pneg %p2482_p2 }
 0x177   : > { %p2490_p10 = pnand %p2489_p5, %p2483_p4 }
 0x179   : > { %2493 = shalt.err (!%p2490_p10)
}
 0x17a   : > { %s3540_s30 = sld [smem:[#allocation47_spill]]  ;;  %s3541_s16 = sld [smem:[#allocation45_spill]] }
 0x17b   : > { %s3542_s25 = sld [smem:[#allocation44_spill]]  ;;  %s3543_s0 = sld [smem:[#allocation43_spill]] }
 0x17c   : > { %s3544_s2 = sld [smem:[#allocation48_spill]]  ;;  %s1709_s28 = sadd.s32 4294967294, %s2704_s29  }
 0x17d   : > { %1968 = dma.hbm_to_vmem [thread:$0]  (!%p2866_p6), %s3488_s15, 16, %s633_s20, [#allocation27]  }
 0x17e   : > { %p74_p3 = scmp.eq.s32.totalorder %s2704_s29, 0  ;;  %p431_p7 = scmp.eq.s32.totalorder %s1709_s28, 1 }
 0x17f   : > { %p1997_p5 = scmp.lt.s32.totalorder %s2704_s29, 2 }
 0x180   : > { %s59_s17 = sadd.s32 1, %s3540_s30  ;;  %s66_s1 = sadd.s32 1, %s3541_s16 }
 0x181   : > { %p61_p8 = scmp.ge.s32.totalorder %s59_s17, 2  ;;  %p73_p1 = scmp.ne.s32.totalorder %s3541_s16, %s3542_s25 }
 0x182   : > { %p79_p12 = scmp.ne.s32.totalorder %s3542_s25, %s3543_s0  ;;  %p425_p6 = scmp.eq.s32.totalorder %s3544_s2, 1 }
 0x183   : > { %s3589_s17 = smov (%p61_p8, %s59_s17), 0  ;;  %p3167_p11 = por %p74_p3, %p73_p1 }
 0x184   : > { %s63_s20 = ssub.s32 %s3540_s30, %s3589_s17  ;;  %p3546_p0 = scmp.eq.s32.totalorder %s3544_s2, 0 }
 0x185   : > { %p64_p13 = scmp.eq.s32.totalorder %s63_s20, 0  ;;  %p3182_p4 = por %p425_p6, %p73_p1 }
 0x186   : > { %p3178_p2 = por %p3546_p0, %p79_p12  ;;  %p3189_p9 = por %p431_p7, %p79_p12 }
 0x187   : > { %s3548_s21 = scalar_select %p3182_p4, 1, 0 }
 0x188   : > { %s3547_s22 = scalar_select %p3178_p2, 1, 0 }
 0x189   : > { %s3187_s23 = scalar_select %p64_p13, %s3541_s16, %s66_s1  }
 0x18a   : > { %s3549_s18 = scalar_select %p3189_p9, 1, 0 }
 0x18b   : > { %s3195_s24 = sand.u32 1, %s3541_s16   ;;  %s1727_s27 = sshll.u32 %s3540_s30, 6 }
 0x18c   : > { %s1726_s26 = sshll.u32 %s3195_s24, 2  ;;  %s3550_s2 = sld [smem:[#allocation50_spill]] }
 0x18d   : > { %s647_s28 = scalar_lea.vmem [#allocation2], %s1726_s26  ;;  %p3206_p10 = pnand %p1997_p5, %p3167_p11 }
 0x18e   : > { %s654_s1 = sshll.u32 %s647_s28, 4  ;;  %s644_s4 = scalar_lea.sflag [#allocation3], %s3195_s24  ;;  %s3210_s1 = int_to_ptr.vmem [resolvable:$true] %s654_s1 }
 0x18f   : > { %p2496_p1 = pneg %p3206_p10 }
 0x192   : > { %s3202_s20 = scalar_lea.hbm %s3550_s2, %s1727_s27  ;;  %s2499_s26 = scalar_lea.hbm %s3550_s2, 128 }
 0x193   : > { %s2494_s25 = scalar_lea.hbm %s3202_s20, 64  ;;  %p2500_p11 = scmp.lt.u32.totalorder %s3202_s20, %s3550_s2 }
 0x194   : > { %p2495_p8 = scmp.ne.s32.totalorder %s3202_s20, %s2494_s25  ;;  %p2501_p6 = scmp.lt.u32.totalorder %s2499_s26, %s2494_s25 }
 0x195   : > { %p2503_p0 = scmp.lt.u32.totalorder %s2494_s25, %s3202_s20 }
 0x196   : > { %p2497_p3 = pnand %p2496_p1, %p2495_p8  ;;  %p2502_p13 = por %p2501_p6, %p2500_p11 }
 0x198   : > { %p2498_p12 = pneg %p2497_p3  ;;  %p2504_p7 = por %p2503_p0, %p2502_p13 }
 0x19a   : > { %p2505_p5 = pnand %p2504_p7, %p2498_p12 }
 0x19c   : > { %2508 = shalt.err (!%p2505_p5)
}
 0x19d   : > { %s2509_s16 = scalar_lea.vmem %s3210_s1, 64  ;;  %s2722_s27 = smov [#allocation2]  }
 0x19e   : > { %p2510_p8 = scmp.ne.s32.totalorder %s3210_s1, %s2509_s16  ;;  %s2514_s19 = sshll.u32 %s2722_s27, 4  ;;  %s2515_s19 = int_to_ptr.vmem [resolvable:$false] %s2514_s19 }
 0x19f   : > { %s2516_s0 = scalar_lea.vmem %s2515_s19, 128  ;;  %p2517_p4 = scmp.lt.s32.totalorder %s3210_s1, %s2515_s19 }
 0x1a0   : > { %p2512_p3 = pnand %p2510_p8, %p2496_p1  ;;  %p2518_p11 = scmp.lt.s32.totalorder %s2516_s0, %s2509_s16 }
 0x1a2   : > { %p2513_p9 = pneg %p2512_p3  ;;  %p2519_p6 = por %p2518_p11, %p2517_p4 }
 0x1a4   : > { %p2520_p13 = pnand %p2519_p6, %p2513_p9 }
 0x1a6   : > { %2523 = shalt.err (!%p2520_p13)
}
 0x1a7   : > { %1972 = dma.hbm_to_vmem [thread:$0]  (!%p3206_p10), %s3202_s20, 64, %s3210_s1, %s644_s4  }
 0x1a8   : > { %s1728_s25 = sshll.u32 %s3540_s30, 4  ;;  %s3552_s27 = sld [smem:[#allocation51_spill]] }
 0x1a9   : > { %s664_s16 = scalar_lea.vmem [#allocation5], %s3195_s24  ;;  %s3554_s0 = sand.u32 1, %s2704_s29  }
 0x1aa   : > { %s671_s19 = sshll.u32 %s664_s16, 4  ;;  %s662_s6 = scalar_lea.sflag [#allocation6], %s3554_s0  ;;  %s672_s19 = int_to_ptr.vmem [resolvable:$true] %s671_s19 }
 0x1ae   : > { %s3553_s2 = smov %s3552_s27  ;;  %s3243_s5 = scalar_lea.hbm %s3552_s27, %s1728_s25 }
 0x1af   : > { %s2524_s7 = scalar_lea.hbm %s3243_s5, 16  ;;  %s2529_s20 = scalar_lea.hbm %s3553_s2, 32 }
 0x1b0   : > { %p2525_p4 = scmp.ne.s32.totalorder %s3243_s5, %s2524_s7  ;;  %p2530_p0 = scmp.lt.u32.totalorder %s3243_s5, %s3553_s2 }
 0x1b1   : > { %p2531_p7 = scmp.lt.u32.totalorder %s2529_s20, %s2524_s7  ;;  %p2533_p8 = scmp.lt.u32.totalorder %s2524_s7, %s3243_s5 }
 0x1b2   : > { %p2527_p9 = pnand %p2525_p4, %p2496_p1 }
 0x1b3   : > { %p2532_p5 = por %p2531_p7, %p2530_p0 }
 0x1b4   : > { %p2528_p12 = pneg %p2527_p9 }
 0x1b5   : > { %p2534_p3 = por %p2533_p8, %p2532_p5 }
 0x1b7   : > { %p2535_p11 = pnand %p2534_p3, %p2528_p12 }
 0x1b9   : > { %2538 = shalt.err (!%p2535_p11)
}
 0x1ba   : > { %s2539_s24 = scalar_lea.vmem %s672_s19, 16  ;;  %s2723_s26 = smov [#allocation5]  }
 0x1bb   : > { %p2540_p6 = scmp.ne.s32.totalorder %s672_s19, %s2539_s24  ;;  %s2544_s28 = sshll.u32 %s2723_s26, 4  ;;  %s2545_s28 = int_to_ptr.vmem [resolvable:$false] %s2544_s28 }
 0x1bc   : > { %s2546_s27 = scalar_lea.vmem %s2545_s28, 32  ;;  %p2547_p9 = scmp.lt.s32.totalorder %s672_s19, %s2545_s28 }
 0x1bd   : > { %p2542_p13 = pnand %p2540_p6, %p2496_p1  ;;  %p2548_p2 = scmp.lt.s32.totalorder %s2546_s27, %s2539_s24 }
 0x1bf   : > { %p2543_p4 = pneg %p2542_p13  ;;  %p2549_p0 = por %p2548_p2, %p2547_p9 }
 0x1c1   : > { %p2550_p7 = pnand %p2549_p0, %p2543_p4 }
 0x1c3   : > { %2553 = shalt.err (!%p2550_p7)
}
 0x1c4   : > { %1975 = dma.hbm_to_vmem [thread:$0]  (!%p3206_p10), %s3243_s5, 16, %s672_s19, %s662_s6  }
 0x1c5   : > { %s3555_s7 = sld [smem:[#allocation49_spill]] }
 0x1cb   : > { %p3556_p12 = scmp.ne.s32.totalorder %s3555_s7, 0 }
 0x1cc   : > { %s3557_s16 = sld [smem:[#allocation44_spill]] (!%p3556_p12)  ;;  %p3558_p2 = scmp.ne.s32.totalorder (!%p3556_p12), %s3547_s22, 0 }
 0x1cd   : > { %680 = sbr.rel (%p3556_p12) target bundleno = 3130 (0xc3a), region = 84 }
 0x1d2   : > { %s3270_s0 = sand.u32 (!%p3556_p12), 1, %s3557_s16  }
 0x1d3   : > { %s1730_s4 = sshll.u32 (!%p3556_p12), %s3270_s0, 2  ;;  %s683_s30 = scalar_lea.sflag (!%p3556_p12), [#allocation3], %s3270_s0 }
 0x1d4   : > { %s3274_s20 = scalar_lea.vmem [#allocation2], %s1730_s4 }
 0x1d5   : > { %2635 = dma.done.wait (%p3558_p2), %s683_s30, 64  }
 0x1d6   : > { %2637 = vsyncadd (%p3558_p2), %s683_s30, 4294967232  ;;  %s3559_s3 = sld [smem:[#allocation48_spill]]  ;;  %s694_s19 = scalar_lea.vmem [#allocation5], %s3270_s0 }
 0x1dc   : > { %s691_s5 = sand.u32 1, %s3559_s3  }
 0x1dd   : > { %s692_s6 = scalar_lea.sflag [#allocation6], %s691_s5 }
 0x1de   : > { %2639 = dma.done.wait (%p3558_p2), %s692_s6, 16  }
 0x1df   : > { %2641 = vsyncadd (%p3558_p2), %s692_s6, 4294967280  ;;  %p3560_p10 = scmp.eq.s32.totalorder %s3559_s3, 0 }
 0x1e1   : > { %2643 = dma.done.wait (%p3560_p10), [#allocation6], 256   ;;  %p3561_p1 = pmov %p3560_p10 }
 0x1e3   : > { %2645 = vsyncadd (%p3561_p1), [#allocation6], 4294967040  ;;  %p3562_p5 = pmov %p3561_p1 }
 0x1e4   : > { %p3563_p8 = pmov %p3561_p1 }
 0x1e5   : > { %2647 = dma.done.wait (%p3562_p5), [#allocation9], 272  }
 0x1e6   : > { %2649 = vsyncadd (%p3563_p8), [#allocation9], 4294967024  ;;  %p3564_p3 = pmov %p3561_p1 }
 0x1e7   : > { %p3565_p11 = pmov %p3561_p1 }
 0x1e8   : > { %2651 = dma.done.wait (%p3564_p3), [#allocation12], 32  }
 0x1e9   : > { %2653 = vsyncadd (%p3565_p11), [#allocation12], 4294967264  ;;  %p3566_p6 = pmov %p3561_p1 }
 0x1ea   : > { %p3567_p13 = pmov %p3561_p1 }
 0x1eb   : > { %2655 = dma.done.wait (%p3566_p6), [#allocation15], 272  }
 0x1ec   : > { %2657 = vsyncadd (%p3567_p13), [#allocation15], 4294967024  ;;  %p3568_p4 = pmov %p3561_p1 }
 0x1ed   : > { %p3569_p9 = pmov %p3561_p1 }
 0x1ee   : > { %2659 = dma.done.wait (%p3568_p4), [#allocation18], 528  }
 0x1ef   : > { %2661 = vsyncadd (%p3569_p9), [#allocation18], 4294966768  ;;  %p3570_p0 = pmov %p3561_p1 }
 0x1f1   : > { %2663 = dma.done.wait (%p3570_p0), [#allocation21], 32   ;;  %p3571_p7 = pmov %p3570_p0 }
 0x1f2   : > { %p3572_p12 = pmov %p3570_p0 }
 0x1f3   : > { %2665 = vsyncadd (%p3571_p7), [#allocation21], 4294967264 }
 0x1f4   : > { %2667 = dma.done.wait (%p3572_p12), [#allocation24], 272   ;;  %p3573_p2 = pmov %p3570_p0 }
 0x1f5   : > { %p3574_p10 = pmov %p3570_p0 }
 0x1f6   : > { %2669 = vsyncadd (%p3573_p2), [#allocation24], 4294967024 }
 0x1f7   : > { %2671 = dma.done.wait (%p3574_p10), [#allocation27], 16   ;;  %p3575_p1 = pmov %p3570_p0 }
 0x1f8   : > { %v2724_v0 = vmov 0.0   ;;  %vm2725_vm0 = vmmov 0   ;;  %v825_v1 = vlaneseq  ;;  %v2080_v3 = vld [vmem:[#allocation7] sm:$0xff]   ;;  %s2726_s22 = smov 96   ;;  %v2081_v5 = vld [vmem:[#allocation7 + $0x8] sm:$0xff]   ;;  %vm849_vm1 = vcmask 261120  }
 0x1f9   : > { %2673 = vsyncadd (%p3575_p1), [#allocation27], 4294967280  ;;  %1798 = vmatprep.subr.bf16.mxu0 %v2724_v0  ;;  %1806 = vmatprep.subr.bf16.mxu1 %v2724_v0  ;;  %v823_v6 = vld [vmem:[#allocation8] sm:$0x1]  ;;  %v3329_v8 = vld [vmem:[%s3274_s20] sm:$0xf] }
 0x1fa   : > { %1802 = vmatprep.mubr.msk.bf16.mxu0 %vm2725_vm0, %v2724_v0  ;;  %1810 = vmatprep.mubr.msk.bf16.mxu1 %vm2725_vm0, %v2724_v0  ;;  %v826_v2 = vshrl.u32 %v825_v1, 7  ;;  %v824_v7 = vunpack.c.l.bf16 %v823_v6  ;;  %v812_v12 = vld [vmem:[%s3274_s20] sm:$0xf]  ;;  %vm994_vm2 = vcmask 64512   ;;  %vm1013_vm3 = vcmask 1043456   ;;  %s3576_s1 = sld [smem:[#allocation46_spill]] }
 0x1fb   : > { %839 = vrot.lane.b32.xlu0 %v2080_v3, %s2726_s22  ;;  %1807 = vmatpush3.bf16.msra.mxu1 %v2080_v3  ;;  %v1752_v28 = vld [vmem:[%s694_s19] ss:$0 sm:$0xff]  ;;  %v2083_v47 = vld [vmem:[#allocation10 + $0x8] sm:$0xff]   ;;  %v1062_v53 = vld [vmem:[#allocation11] sm:$0x1]  ;;  %v1123_v56 = vunpack.c.l.bf16 %v3329_v8  ;;  %vm1267_vm4 = vcmask 523264  }
 0x1fc   : > { %v3324_v4 = vsub.s32 0, %v826_v2  ;;  %1808 = vmatprep.subr.bf16.mxu1 %v2724_v0  ;;  %v2082_v40 = vld [vmem:[#allocation10] sm:$0xff]   ;;  %v1063_v54 = vunpack.c.l.bf16 %v1062_v53  ;;  %s1745_s25 = sshll.u32 %s3270_s0, 3  ;;  %s3577_s16 = sld [smem:[#allocation58_spill]] }
 0x1fd   : > { %s802_s24 = scalar_lea.vmem [#allocation28], %s1745_s25  ;;  %s1408_s30 = scalar_lea.sflag [#allocation4], %s3270_s0 }
 0x1fe   : > { %v828_v9 = vrot.slane %v824_v7, %v3324_v4  ;;  %v1067_v55 = vrot.slane %v1063_v54, %v3324_v4  ;;  %v2084_v7 = vld [vmem:[#allocation16] sm:$0xff]   ;;  %s1427_s28 = sshll.u32 %s802_s24, 4  ;;  %p3578_p8 = scmp.ne.s32.totalorder %s3548_s21, 0  ;;  %s1428_s28 = int_to_ptr.vmem [resolvable:$true] %s1427_s28 }
 0x1ff   : > { %841 = vrot.lane.b32.xlu0 %v2081_v5, %s2726_s22  ;;  %1809 = vmatpush3.bf16.msra.mxu1 %v2081_v5  ;;  %s2554_s20 = scalar_lea.vmem %s1428_s28, 128  ;;  %s2727_s3 = smov [#allocation28]  }
 0x200   : > { %846 = vrot.lane.b32.xlu1 %v828_v9, %s2726_s22  ;;  %1820 = vmatprep.subr.bf16.mxu1 %v2724_v0  ;;  %s1770_s26 = sshll.u32 %s3576_s1, 7  ;;  %p2555_p5 = scmp.ne.s32.totalorder %s1428_s28, %s2554_s20 }
 0x201   : > { %s2558_s5 = sshll.u32 %s2727_s3, 4  ;;  %s2559_s5 = int_to_ptr.vmem [resolvable:$false] %s2558_s5 }
 0x202   : > { %1811 = vmatmul.mubr.msk.bf16.vlgmr.msra.gmra.mrb[0].mxu1 %vm849_vm1, %v3329_v8  ;;  %v2085_v8 = vld [vmem:[#allocation16 + $0x8] sm:$0xff]   ;;  %s3396_s4 = scalar_lea.hbm %s3577_s16, %s1770_s26  ;;  %p2556_p3 = pnand %p2555_p5, %p3578_p8 }
 0x203   : > { %1822 = vmatprep.mubr.msk.bf16.mxu1 %vm2725_vm0, %v2724_v0  ;;  %s2560_s6 = scalar_lea.vmem %s2559_s5, 256  ;;  %p2561_p6 = scmp.lt.s32.totalorder %s1428_s28, %s2559_s5 }
 0x204   : > { %p2557_p11 = pneg %p2556_p3  ;;  %p2562_p13 = scmp.lt.s32.totalorder %s2560_s6, %s2554_s20 }
 0x206   : > { %p2563_p4 = por %p2562_p13, %p2561_p6 }
 0x208   : > { %p2564_p9 = pnand %p2563_p4, %p2557_p11 }
 0x26d   : > { %v840_v10 = vpop.permute.xlu0 %839 }
 0x26e   : > { %1799 = vmatpush3.bf16.msra.mxu0 %v840_v10 }
 0x26f   : > { %1800 = vmatprep.subr.bf16.mxu0 %v2724_v0 }
 0x271   : > { %v842_v11 = vpop.permute.xlu0 %841 }
 0x272   : > { %1801 = vmatpush3.bf16.msra.mxu0 %v842_v11  ;;  %v847_v17 = vpop.permute.xlu1 %846 }
 0x273   : > { %1814 = vmatprep.subr.bf16.mxu0 %v2724_v0 }
 0x275   : > { %1803 = vmatmul.mubr.msk.bf16.vlgmr.msra.gmra.mrb[0].mxu0 %vm849_vm1, %v812_v12  ;;  %v1125_v12 = vld [vmem:[#allocation13] sm:$0x1] }
 0x276   : > { %1816 = vmatprep.mubr.msk.bf16.mxu0 %vm2725_vm0, %v2724_v0 }
 0x2d5   : > { %v932_v13 = vpop.f32.mrb[0].mxu1 }
 0x2d6   : > { %v1812_v14 = vpop.f32.mrb[1].mxu1  ;;  %v933_v25 = vadd.f32 %v932_v13, %v828_v9  ;;  %v1127_v13 = vld [vmem:[#allocation14] sm:$0x1] }
 0x2d7   : > { %v935_v15 = vpop.f32.mrb[2].mxu1  ;;  %v1126_v14 = vunpack.c.l.bf16 %v1125_v12 }
 0x2d8   : > { %v1813_v16 = vpop.f32.mrb[3].mxu1  ;;  %v938_v26 = vpack.c.bf16 %v933_v25, %v933_v25  ;;  %v1128_v15 = vunpack.c.l.bf16 %v1127_v13  ;;  %v2088_v25 = vld [vmem:[#allocation19 + $0x10] sm:$0xff]  }
 0x2d9   : > { %v1146_v16 = vrot.slane %v1126_v14, %v3324_v4 }
 0x348   : > { %v887_v18 = vpop.f32.mrb[0].mxu0 }
 0x349   : > { %v888_v19 = vadd.f32 %v887_v18, %v847_v17  ;;  %v1804_v20 = vpop.f32.mrb[1].mxu0 }
 0x34a   : > { %v890_v21 = vpop.f32.mrb[2].mxu0 }
 0x34b   : > { %v939_v22 = vpack.c.bf16 %v888_v19, %v888_v19  ;;  %v1805_v23 = vpop.f32.mrb[3].mxu0  ;;  %v1151_v19 = vrot.slane %v1128_v15, %v3324_v4 }
 0x34c   : > { %v2086_v23 = vld [vmem:[#allocation19] sm:$0xff]  }
 0x34d   : > { %v944_v24 = vsel %vm849_vm1, %v939_v22, 0 }
 0x34e   : > { %1815 = vmatpush3.bf16.xpose.msra.mxu0 %v944_v24  ;;  %v2087_v24 = vld [vmem:[#allocation19 + $0x8] sm:$0xff]  }
 0x34f   : > { %1826 = vmatprep.subr.bf16.mxu0 %v2724_v0 }
 0x355   : > { %1817 = vmatmul.mubr.msk.bf16.vlgmr.msra.gmra.mrb[4].mxu0 %vm849_vm1, %v938_v26  ;;  %v2089_v26 = vld [vmem:[#allocation19 + $0x18] sm:$0xff]  }
 0x356   : > { %1830 = vmatprep.mubr.msk.bf16.mxu0 %vm2725_vm0, %v2724_v0  ;;  %1827 = vmatpush3.bf16.msra.mxu0 %v2082_v40 }
 0x357   : > { %1828 = vmatprep.subr.bf16.mxu0 %v2724_v0 }
 0x35a   : > { %1829 = vmatpush3.bf16.msra.mxu0 %v2083_v47 }
 0x35b   : > { %1842 = vmatprep.subr.bf16.mxu0 %v2724_v0 }
 0x428   : > { %v980_v27 = vpop.f32.mrb[4].mxu0 }
 0x429   : > { %v986_v29 = vmul.f32 0.17677669, %v980_v27  ;;  %v1818_v30 = vpop.f32.mrb[5].mxu0  ;;  %v1158_v27 = vld [vmem:[#allocation17] sm:$0x1] }
 0x42a   : > { %v983_v31 = vpop.f32.mrb[6].mxu0 }
 0x42b   : > { %v1819_v32 = vpop.f32.mrb[7].mxu0  ;;  %v993_v33 = vadd.f32 %v1752_v28, %v986_v29  ;;  %v1159_v28 = vunpack.c.l.bf16 %v1158_v27 }
 0x42d   : > { %v995_v34 = vsel %vm994_vm2, %v993_v33, -inf  ;;  %v1163_v29 = vrot.slane %v1159_v28, %v3324_v4 }
 0x42e   : > { %996 = vmax.xlane.f32.xlu1 %v995_v34 }
 0x4bb   : > { %v997_v35 = vpop.xlane.xlu1 %996 }
 0x4bc   : > { %v998_v36 = vsub.f32 %v993_v33, %v997_v35 }
 0x4be   : > { %v999_v37 = vmul.f32 1.442695, %v998_v36 }
 0x4c0   : > { %2092 = vpow2.f32 %v999_v37 }
 0x4ca   : > { %v2093_v38 = vpop.eup %2092 }
 0x4cb   : > { %v1001_v39 = vsel %vm994_vm2, %v2093_v38, 0.0 }
 0x4cc   : > { %1002 = vadd.xlane.f32.xlu0 %v1001_v39 }
 0x4e2   : > { %1008 = vrot.lane.b32.xlu0 %v939_v22, %s2726_s22 }
 0x559   : > { %v1003_v41 = vpop.xlane.xlu0 %1002 }
 0x55a   : > { %2094 = vrcp.f32 %v1003_v41 }
 0x55d   : > { %v1009_v42 = vpop.permute.xlu0 %1008 }
 0x55e   : > { %v1015_v43 = vsel %vm1013_vm3, %v1009_v42, 0 }
 0x55f   : > { %1821 = vmatpush3.bf16.msra.mxu1 %v1015_v43 }
 0x560   : > { %1834 = vmatprep.subr.bf16.mxu1 %v2724_v0 }
 0x564   : > { %v2095_v44 = vpop.eup %2094 }
 0x565   : > { %v1005_v45 = vmul.f32 %v2095_v44, %v2093_v38 }
 0x567   : > { %v1006_v46 = vpack.c.bf16 %v1005_v45, %v1005_v45  ;;  %v1237_v45 = vld [vmem:[#allocation20] sm:$0x1] }
 0x569   : > { %1823 = vmatmul.mubr.msk.bf16.vlgmr.msra.gmra.mrb[4].mxu1 %vm994_vm2, %v1006_v46  ;;  %v1238_v46 = vunpack.c.l.bf16 %v1237_v45 }
 0x56a   : > { %1838 = vmatprep.mubr.msk.bf16.mxu1 %vm2725_vm0, %v2724_v0  ;;  %1835 = vmatpush3.bf16.msra.mxu1 %v2084_v7 }
 0x56b   : > { %1836 = vmatprep.subr.bf16.mxu1 %v2724_v0  ;;  %v1242_v47 = vrot.slane %v1238_v46, %v3324_v4 }
 0x56e   : > { %1837 = vmatpush3.bf16.msra.mxu1 %v2085_v8 }
 0x56f   : > { %1854 = vmatprep.subr.bf16.mxu1 %v2724_v0 }
 0x63c   : > { %v1051_v48 = vpop.f32.mrb[4].mxu1 }
 0x63d   : > { %v1057_v49 = vpack.c.bf16 %v1051_v48, %v1051_v48  ;;  %v1824_v50 = vpop.f32.mrb[5].mxu1 }
 0x63e   : > { %v1054_v51 = vpop.f32.mrb[6].mxu1 }
 0x63f   : > { %v1825_v52 = vpop.f32.mrb[7].mxu1  ;;  %1831 = vmatmul.mubr.msk.bf16.vlgmr.msra.gmra.mrb[8].mxu0 %vm849_vm1, %v1057_v49 }
 0x640   : > { %1850 = vmatprep.mubr.msk.bf16.mxu0 %vm2725_vm0, %v2724_v0  ;;  %1843 = vmatpush3.bf16.msra.mxu0 %v2086_v23 }
 0x641   : > { %1844 = vmatprep.subr.bf16.mxu0 %v2724_v0 }
 0x644   : > { %1845 = vmatpush3.bf16.msra.mxu0 %v2087_v24 }
 0x645   : > { %1846 = vmatprep.subr.bf16.mxu0 %v2724_v0 }
 0x648   : > { %1847 = vmatpush3.bf16.msra.mxu0 %v2088_v25 }
 0x649   : > { %1848 = vmatprep.subr.bf16.mxu0 %v2724_v0 }
 0x64c   : > { %1849 = vmatpush3.bf16.msra.mxu0 %v2089_v26 }
 0x712   : > { %v1117_v57 = vpop.f32.mrb[8].mxu0 }
 0x713   : > { %v1118_v58 = vadd.f32 %v1117_v57, %v1067_v55  ;;  %v1832_v59 = vpop.f32.mrb[9].mxu0 }
 0x714   : > { %v1120_v60 = vpop.f32.mrb[10].mxu0 }
 0x715   : > { %v1833_v61 = vpop.f32.mrb[11].mxu0  ;;  %v1124_v62 = vadd.f32 %v1123_v56, %v1118_v58  ;;  %v2090_v60 = vld [vmem:[#allocation25] sm:$0xff]  }
 0x716   : > { %v2091_v61 = vld [vmem:[#allocation25 + $0x8] sm:$0xff]  }
 0x717   : > { %v1129_v63 = vsel %vm849_vm1, %v1124_v62, 0.0 }
 0x718   : > { %1130 = vadd.xlane.f32.xlu1 %v1129_v63 }
 0x7a5   : > { %v1131_v1 = vpop.xlane.xlu1 %1130 }
 0x7a6   : > { %v1133_v2 = vmul.f32 0.03125, %v1131_v1 }
 0x7a8   : > { %v1134_v3 = vsub.f32 %v1124_v62, %v1133_v2  ;;  %v1312_v2 = vld [vmem:[#allocation22] sm:$0x1] }
 0x7aa   : > { %v1135_v5 = vmul.f32 %v1134_v3, %v1134_v3 }
 0x7ac   : > { %v1136_v6 = vsel %vm849_vm1, %v1135_v5, 0.0  ;;  %v1313_v5 = vunpack.c.l.bf16 %v1312_v2 }
 0x7ad   : > { %1137 = vadd.xlane.f32.xlu1 %v1136_v6 }
 0x7ae   : > { %v1332_v7 = vrot.slane %v1313_v5, %v3324_v4 }
 0x83a   : > { %v1138_v9 = vpop.xlane.xlu1 %1137 }
 0x83b   : > { %v1139_v10 = vmul.f32 0.03125, %v1138_v9 }
 0x83d   : > { %v1140_v11 = vadd.f32 1e-07, %v1139_v10 }
 0x83f   : > { %2096 = vrsqrt.f32 %v1140_v11 }
 0x849   : > { %v2097_v17 = vpop.eup %2096 }
 0x84a   : > { %v1142_v18 = vmul.f32 %v2097_v17, %v1134_v3  ;;  %v1314_v3 = vld [vmem:[#allocation23] sm:$0x1] }
 0x84b   : > { %v1315_v6 = vunpack.c.l.bf16 %v1314_v3 }
 0x84c   : > { %v1147_v20 = vmul.f32 %v1146_v16, %v1142_v18 }
 0x84e   : > { %v1152_v21 = vadd.f32 %v1151_v19, %v1147_v20 }
 0x850   : > { %v1153_v22 = vpack.c.bf16 %v1152_v21, %v1152_v21 }
 0x852   : > { %1839 = vmatmul.mubr.msk.bf16.vlgmr.msra.gmra.mrb[8].mxu1 %vm849_vm1, %v1153_v22 }
 0x853   : > { %1858 = vmatprep.mubr.msk.bf16.mxu1 %vm2725_vm0, %v2724_v0  ;;  %1855 = vmatpush3.bf16.msra.mxu1 %v2090_v60 }
 0x854   : > { %1856 = vmatprep.subr.bf16.mxu1 %v2724_v0  ;;  %v1337_v0 = vrot.slane %v1315_v6, %v3324_v4 }
 0x857   : > { %1857 = vmatpush3.bf16.msra.mxu1 %v2091_v61 }
 0x925   : > { %v1213_v30 = vpop.f32.mrb[8].mxu1 }
 0x926   : > { %v1214_v31 = vadd.f32 %v1213_v30, %v1163_v29  ;;  %v1840_v32 = vpop.f32.mrb[9].mxu1 }
 0x927   : > { %v1216_v33 = vpop.f32.mrb[10].mxu1 }
 0x928   : > { %v1220_v34 = vmul.f32 0.044715, %v1214_v31  ;;  %v1841_v35 = vpop.f32.mrb[11].mxu1  ;;  %v1219_v41 = vmul.f32 0.5, %v1214_v31 }
 0x92a   : > { %v1221_v36 = vmul.f32 %v1220_v34, %v1214_v31 }
 0x92c   : > { %v1222_v37 = vmul.f32 %v1221_v36, %v1214_v31 }
 0x92e   : > { %v1223_v38 = vadd.f32 %v1222_v37, %v1214_v31 }
 0x930   : > { %v1224_v39 = vmul.f32 0.7978846, %v1223_v38 }
 0x932   : > { %2098 = vtanh.f32 %v1224_v39 }
 0x93c   : > { %v2099_v40 = vpop.eup %2098 }
 0x93d   : > { %v1226_v42 = vadd.f32 1.0, %v2099_v40 }
 0x93f   : > { %v1227_v43 = vmul.f32 %v1226_v42, %v1219_v41 }
 0x941   : > { %v1228_v44 = vpack.c.bf16 %v1227_v43, %v1227_v43 }
 0x943   : > { %1851 = vmatmul.mubr.msk.bf16.vlgmr.msra.gmra.mrb[12].mxu0 %vm1267_vm4, %v1228_v44 }
 0xa16   : > { %v1305_v48 = vpop.f32.mrb[12].mxu0 }
 0xa17   : > { %v1306_v49 = vadd.f32 %v1305_v48, %v1242_v47  ;;  %v1852_v50 = vpop.f32.mrb[13].mxu0 }
 0xa18   : > { %v1308_v51 = vpop.f32.mrb[14].mxu0 }
 0xa19   : > { %v1853_v52 = vpop.f32.mrb[15].mxu0  ;;  %v1311_v53 = vadd.f32 %v1306_v49, %v1152_v21 }
 0xa1b   : > { %v1316_v54 = vsel %vm849_vm1, %v1311_v53, 0.0 }
 0xa1c   : > { %1317 = vadd.xlane.f32.xlu1 %v1316_v54 }
 0xaa9   : > { %v1318_v55 = vpop.xlane.xlu1 %1317 }
 0xaaa   : > { %v1319_v56 = vmul.f32 0.03125, %v1318_v55 }
 0xaac   : > { %v1320_v57 = vsub.f32 %v1311_v53, %v1319_v56 }
 0xaae   : > { %v1321_v58 = vmul.f32 %v1320_v57, %v1320_v57 }
 0xab0   : > { %v1322_v59 = vsel %vm849_vm1, %v1321_v58, 0.0 }
 0xab1   : > { %1323 = vadd.xlane.f32.xlu1 %v1322_v59 }
 0xb3e   : > { %v1324_v62 = vpop.xlane.xlu1 %1323 }
 0xb3f   : > { %v1325_v63 = vmul.f32 0.03125, %v1324_v62 }
 0xb41   : > { %v1326_v1 = vadd.f32 1e-07, %v1325_v63 }
 0xb43   : > { %2100 = vrsqrt.f32 %v1326_v1 }
 0xb4d   : > { %v2101_v8 = vpop.eup %2100 }
 0xb4e   : > { %v1328_v9 = vmul.f32 %v2101_v8, %v1320_v57 }
 0xb50   : > { %v1333_v10 = vmul.f32 %v1332_v7, %v1328_v9 }
 0xb52   : > { %v1338_v11 = vadd.f32 %v1337_v0, %v1333_v10 }
 0xb54   : > { %v1339_v12 = vpack.c.bf16 %v1338_v11, %v1338_v11  ;;  %1405 = vst.msk [vmem:[%s802_s24] sm:$0xff] %vm849_vm1, %v1338_v11 }
 0xb56   : > { %1859 = vmatmul.mubr.msk.bf16.vlgmr.msra.gmra.mrb[12].mxu1 %vm849_vm1, %v1339_v12 }
 0xb57   : > { %2567 = shalt.err (!%p2564_p9)
}
 0xb58   : > { %s2568_s19 = scalar_lea.hbm %s3396_s4, 128  ;;  %s2572_s27 = scalar_lea.hbm %s3577_s16, 256 }
 0xb59   : > { %p2569_p0 = scmp.ne.s32.totalorder %s3396_s4, %s2568_s19  ;;  %p2573_p2 = scmp.lt.u32.totalorder %s3396_s4, %s3577_s16 }
 0xb5a   : > { %p2574_p10 = scmp.lt.u32.totalorder %s2572_s27, %s2568_s19  ;;  %p2576_p5 = scmp.lt.u32.totalorder %s2568_s19, %s3396_s4 }
 0xb5b   : > { %p2570_p7 = pnand %p2569_p0, %p3578_p8 }
 0xb5c   : > { %p2575_p1 = por %p2574_p10, %p2573_p2 }
 0xb5d   : > { %p2571_p12 = pneg %p2570_p7 }
 0xb5e   : > { %p2577_p3 = por %p2576_p5, %p2575_p1 }
 0xb60   : > { %p2578_p11 = pnand %p2577_p3, %p2571_p12 }
 0xb62   : > { %2581 = shalt.err (!%p2578_p11)
}
 0xb63   : > { %1922 = dma.vmem_to_hbm [thread:$0]  (%p3578_p8), %s1428_s28, 128, %s3396_s4, %s1408_s30   ;;  %v1344_v13 = vld [vmem:[#allocation26] sm:$0x1] }
 0xb64   : > { %v1345_v14 = vunpack.c.l.bf16 %v1344_v13  ;;  %s809_s20 = scalar_lea.vmem [#allocation29], %s1745_s25  ;;  %s3579_s22 = sld [smem:[#allocation59_spill]] }
 0xb65   : > { %s1441_s5 = sshll.u32 %s809_s20, 4  ;;  %s1413_s28 = scalar_lea.sflag [#allocation30], %s3270_s0  ;;  %s3426_s5 = int_to_ptr.vmem [resolvable:$true] %s1441_s5 }
 0xb66   : > { %v1349_v15 = vrot.slane %v1345_v14, %v3324_v4  ;;  %s2582_s25 = scalar_lea.vmem %s3426_s5, 128  ;;  %s2728_s1 = smov [#allocation29]  }
 0xb67   : > { %p2583_p6 = scmp.ne.s32.totalorder %s3426_s5, %s2582_s25  ;;  %s2586_s4 = sshll.u32 %s2728_s1, 4  ;;  %s2587_s4 = int_to_ptr.vmem [resolvable:$false] %s2586_s4 }
 0xb68   : > { %s2588_s30 = scalar_lea.vmem %s2587_s4, 256  ;;  %p2589_p9 = scmp.lt.s32.totalorder %s3426_s5, %s2587_s4 }
 0xb69   : > { %p2584_p13 = pnand %p2583_p6, %p3578_p8  ;;  %p2590_p0 = scmp.lt.s32.totalorder %s2588_s30, %s2582_s25 }
 0xb6a   : > { %s3424_s24 = scalar_lea.hbm %s3579_s22, %s1770_s26 }
 0xb6b   : > { %p2585_p4 = pneg %p2584_p13  ;;  %p2591_p7 = por %p2590_p0, %p2589_p9 }
 0xb6d   : > { %p2592_p12 = pnand %p2591_p7, %p2585_p4 }
 0xc29   : > { %v1399_v16 = vpop.f32.mrb[12].mxu1 }
 0xc2a   : > { %v1400_v17 = vadd.f32 %v1399_v16, %v1349_v15  ;;  %v1860_v18 = vpop.f32.mrb[13].mxu1 }
 0xc2b   : > { %v1402_v19 = vpop.f32.mrb[14].mxu1 }
 0xc2c   : > { %1406 = vst [vmem:[%s809_s20] sm:$0xff] %v1400_v17  ;;  %v1861_v4 = vpop.f32.mrb[15].mxu1 }
 0xc2d   : > { %2595 = shalt.err (!%p2592_p12)
}
 0xc2e   : > { %s2596_s0 = scalar_lea.hbm %s3424_s24, 128  ;;  %s2600_s7 = scalar_lea.hbm %s3579_s22, 256 }
 0xc2f   : > { %p2597_p2 = scmp.ne.s32.totalorder %s3424_s24, %s2596_s0  ;;  %p2601_p5 = scmp.lt.u32.totalorder %s3424_s24, %s3579_s22 }
 0xc30   : > { %p2602_p3 = scmp.lt.u32.totalorder %s2600_s7, %s2596_s0  ;;  %p2604_p6 = scmp.lt.u32.totalorder %s2596_s0, %s3424_s24 }
 0xc31   : > { %p2598_p10 = pnand %p2597_p2, %p3578_p8 }
 0xc32   : > { %p2603_p11 = por %p2602_p3, %p2601_p5 }
 0xc33   : > { %p2599_p1 = pneg %p2598_p10 }
 0xc34   : > { %p2605_p13 = por %p2604_p6, %p2603_p11 }
 0xc36   : > { %p2606_p4 = pnand %p2605_p13, %p2599_p1 }
 0xc38   : > { %2609 = shalt.err (!%p2606_p4)
}
 0xc39   : > { %1923 = dma.vmem_to_hbm [thread:$0]  (%p3578_p8), %s3426_s5, 128, %s3424_s24, %s1413_s28  }
 0xc3a PF: > { %s3580_s6 = sld [smem:[#allocation43_spill]]  ;;  %p3581_p9 = scmp.ne.s32.totalorder %s3549_s18, 0 }
 0xc3b   : > { %p3582_p0 = scmp.ge.s32.totalorder %s2704_s29, 2 }
 0xc3d   : > { %p1977_p7 = pnand %p3582_p0, %p3581_p9 }
 0xc40   : > { %s1453_s19 = sand.u32 1, %s3580_s6  }
 0xc41   : > { %s1454_s25 = scalar_lea.sflag [#allocation4], %s1453_s19 }
 0xc42   : > { %2675 = dma.done.wait (!%p1977_p7), %s1454_s25, 128  }
 0xc43   : > { %2677 = vsyncadd (!%p1977_p7), %s1454_s25, 4294967168  ;;  %s1463_s1 = scalar_lea.sflag [#allocation30], %s1453_s19 }
 0xc44   : > { %2679 = dma.done.wait (!%p1977_p7), %s1463_s1, 128  }
 0xc45   : > { %2681 = vsyncadd (!%p1977_p7), %s1463_s1, 4294967168  ;;  %s47_s29 = sadd.s32 1, %s2704_s29   ;;  %s3583_s24 = sld [smem:[#allocation44_spill]] }
 0xc46   : > { %p44_p12 = scmp.ge.s32.totalorder %s47_s29, 4   ;;  %s3584_s25 = sld [smem:[#allocation45_spill]] }
 0xc47   : > { %s3585_s27 = sld [smem:[#allocation47_spill]]  ;;  %s3586_s26 = smov %s3187_s23 }
 0xc48   : > { %s3587_s28 = smov %s3589_s17  ;;  %46 = sbr.rel (!%p44_p12) target bundleno = 28 (0x1c), region = 216 }
 0xc4f   :  { %1468 = vsyncpa [#allocation3], 1 }
 0xc50   :  { %1470 = vsyncpa [#allocation3 + $0x1], 1 }
 0xc51   :  { %1471 = vsyncpa [#allocation6], 1 }
 0xc52   :  { %1473 = vsyncpa [#allocation6 + $0x1], 1 }
 0xc53   :  { %1474 = vsyncpa [#allocation9], 1 }
 0xc54   :  { %1475 = vsyncpa [#allocation12], 1 }
 0xc55   :  { %1476 = vsyncpa [#allocation15], 1 }
 0xc56   :  { %1477 = vsyncpa [#allocation18], 1 }
 0xc57   :  { %1478 = vsyncpa [#allocation21], 1 }
 0xc58   :  { %1479 = vsyncpa [#allocation24], 1 }
 0xc59   :  { %1480 = vsyncpa [#allocation27], 1 }
 0xc5a   :  { %1481 = vsyncpa [#allocation4], 1 }
 0xc5b   :  { %1483 = vsyncpa [#allocation4 + $0x1], 1 }
 0xc5c   :  { %1484 = vsyncpa [#allocation30], 1 }
 0xc5d   :  { %1486 = vsyncpa [#allocation30 + $0x1], 1 }

</bundles_post_ra>
